<compile_context>
chip_gen: v7x
topology: tpu7x:2x2x1
jax: 0.10.0
libtpu: 0.0.40
codegen_flags: <defaults>
</compile_context>

<pallas_src>
import functools

import jax
import jax.numpy as jnp
import numpy as np
from jax import lax
from jax.experimental import pallas as pl
from jax.experimental.pallas import tpu as pltpu


def _round_up(x, m):
    return (x + m - 1) // m * m


def _padded_bytes(shape, itemsize):
    """VMEM footprint of a buffer, padded to (sublane, lane) hardware tiles."""
    shape = tuple(int(d) for d in shape)
    if len(shape) == 1:
        shape = (1,) + shape
    lead = 1
    for d in shape[:-2]:
        lead *= d
    sub = _round_up(shape[-2], 16)      # conservative (bf16 sublane packing)
    lane = _round_up(shape[-1], 128)
    return lead * sub * lane * itemsize


def _pick_th(n, h_out, w_out, max_rows=512):
    """Output-row tile height th (divides h_out).

    Targets <=512 matmul rows per grid step, prefers sublane-aligned row
    counts, and >=4 total grid steps so the parallel axes can shard across
    TensorCores.
    """
    divisors = [d for d in range(h_out, 0, -1) if h_out % d == 0]
    fit = [d for d in divisors if d * w_out <= max_rows]
    if not fit:
        return 1
    aligned = [d for d in fit if (d * w_out) % 8 == 0] or fit
    for d in aligned:
        if n * (h_out // d) >= 4:
            return d
    return aligned[0]


def _block_spec(block_shape, index_map, *, buffered=None):
    """BlockSpec, optionally single/multi-buffered (graceful on older JAX)."""
    if buffered is not None:
        try:
            return pl.BlockSpec(block_shape, index_map,
                                pipeline_mode=pl.Buffered(buffered))
        except (TypeError, AttributeError):
            pass
    return pl.BlockSpec(block_shape, index_map)


# ----------------------------- Pallas kernel ------------------------------ #
def _conv_bn_relu_kernel(x_ref, w_ref, shift_ref, o_ref, *,
                         kh, kw, stride, th, w_out):
    # x_ref:     (H_p, W_p, C_in)       padded NHWC image (one batch elem), bf16
    # w_ref:     (kh*kw*C_in, C_out_p)  BN-scale-folded im2col weights, bf16
    # shift_ref: (1, C_out_p)           BN shift, f32
    # o_ref:     (th*w_out, C_out_p)    flat output tile, bf16
    c_in = x_ref.shape[-1]
    h = pl.program_id(1)
    r0 = h * th * stride                 # first padded input row of this tile

    # Assemble the im2col LHS tile in VMEM from the kh*kw shifted windows.
    # Each tap reshape only collapses leading dims (minor dim C_in preserved);
    # the concat is along lanes (pure block placement once C_in >= 128).
    taps = []
    for ky in range(kh):
        for kx in range(kw):
            if stride == 1:
                xs = x_ref[pl.ds(r0 + ky, th), pl.ds(kx, w_out), :]
            else:
                xs = x_ref[pl.ds(r0 + ky, th, stride),
                           pl.ds(kx, w_out, stride), :]
            taps.append(xs.reshape(th * w_out, c_in))
    lhs = taps[0] if len(taps) == 1 else jnp.concatenate(taps, axis=-1)

    # One MXU matmul with K = kh*kw*C_in, f32 accumulation.
    acc = jnp.dot(lhs, w_ref[...], preferred_element_type=jnp.float32)

    # Fused BatchNorm shift + ReLU epilogue, bf16 store (lane-dense).
    y = jnp.maximum(acc + shift_ref[...], 0.0)
    o_ref[...] = y.astype(o_ref.dtype)


# ------------------------------ glue (JAX) -------------------------------- #
def _fused_conv_bn_relu(x_nchw, weight, gamma, beta, mean, var, *,
                        stride, padding, eps):
    N, C_in, H, W = x_nchw.shape
    C_out, _, kh, kw = weight.shape
    H_out = (H + 2 * padding - kh) // stride + 1
    W_out = (W + 2 * padding - kw) // stride + 1
    C_out_p = _round_up(C_out, 128)
    H_p, W_p = H + 2 * padding, W + 2 * padding
    K = kh * kw * C_in

    # NCHW -> NHWC (channels on the lane axis), spatial zero-pad, bf16.
    x = jnp.transpose(x_nchw, (0, 2, 3, 1))
    x = jnp.pad(x, ((0, 0), (padding, padding), (padding, padding), (0, 0)))
    x = x.astype(jnp.bfloat16)

    # Fold BN scale into the conv weight (exact rewrite); reorder to im2col
    # layout (ky, kx, c)-major and zero-pad C_out to a lane-dense 128 multiple.
    scale = gamma / jnp.sqrt(var + eps)                  # (C_out,)
    shift = beta - mean * scale                          # (C_out,)
    w = weight * scale[:, None, None, None]              # (C_out, C_in, kh, kw)
    w = jnp.transpose(w, (2, 3, 1, 0)).reshape(K, C_out)
    w = jnp.pad(w, ((0, 0), (0, C_out_p - C_out))).astype(jnp.bfloat16)
    shift_p = jnp.pad(shift, (0, C_out_p - C_out)).reshape(1, C_out_p)
    shift_p = shift_p.astype(jnp.float32)

    th = _pick_th(N, H_out, W_out)
    tile_rows = th * W_out
    grid = (N, H_out // th)

    kernel = functools.partial(_conv_bn_relu_kernel, kh=kh, kw=kw,
                               stride=stride, th=th, w_out=W_out)

    # Explicit scoped-VMEM budget from the actual buffers (image double
    # buffered, weights/shift single buffered, output tile double buffered,
    # plus the in-kernel im2col LHS and f32 accumulator).
    img_b = _padded_bytes((H_p, W_p, C_in), 2)
    w_b = _padded_bytes((K, C_out_p), 2)
    shift_b = _padded_bytes((1, C_out_p), 4)
    out_b = _padded_bytes((tile_rows, C_out_p), 2)
    lhs_b = _padded_bytes((tile_rows, K), 2)
    acc_b = _padded_bytes((tile_rows, C_out_p), 4)
    needed = 2 * img_b + w_b + shift_b + 2 * out_b + lhs_b + acc_b
    vmem_limit = int(min(96 * 2**20, max(2 * needed + 16 * 2**20, 32 * 2**20)))

    flops = 2 * N * H_out * W_out * K * C_out_p
    bytes_accessed = (int(x.size) * 2 + int(w.size) * 2 + int(shift_p.size) * 4
                      + N * H_out * W_out * C_out_p * 2)

    out = pl.pallas_call(
        kernel,
        out_shape=jax.ShapeDtypeStruct((N, H_out * W_out, C_out_p),
                                       jnp.bfloat16),
        grid_spec=pltpu.PrefetchScalarGridSpec(
            num_scalar_prefetch=0,
            grid=grid,
            in_specs=[
                # Whole padded image of batch n; block index constant along h
                # so it is DMA'd once per batch element.
                pl.BlockSpec((None, H_p, W_p, C_in),
                             lambda n, h: (n, 0, 0, 0)),
                # Resident operands: constant index_map, single buffered.
                _block_spec((K, C_out_p), lambda n, h: (0, 0), buffered=1),
                _block_spec((1, C_out_p), lambda n, h: (0, 0), buffered=1),
            ],
            out_specs=pl.BlockSpec((None, tile_rows, C_out_p),
                                   lambda n, h: (n, h, 0)),
        ),
        compiler_params=pltpu.CompilerParams(
            dimension_semantics=("parallel", "parallel"),
            vmem_limit_bytes=vmem_limit),
        cost_estimate=pl.CostEstimate(flops=flops, transcendentals=0,
                                      bytes_accessed=bytes_accessed),
    )(x, w, shift_p)

    # Back to the PyTorch NCHW f32 interface; drop channel padding.
    out = out[..., :C_out].reshape(N, H_out, W_out, C_out)
    return jnp.transpose(out, (0, 3, 1, 2)).astype(jnp.float32)


class BasicConv2dPallas:
    """Deterministically-initialized equivalent of the PyTorch BasicConv2d."""

    def __init__(self, in_channels, out_channels, kernel_size=3, stride=1,
                 padding=1, key=None):
        self.in_channels = in_channels
        self.out_channels = out_channels
        self.kh = self.kw = kernel_size
        self.stride = stride
        self.padding = padding
        self.eps = 1e-3

        key = jax.random.PRNGKey(0) if key is None else key
        k_w, k_g, k_b, k_m, k_v = jax.random.split(key, 5)
        # Conv2d weight (C_out, C_in, kh, kw), bias=False
        self.weight = 0.1 * jax.random.normal(
            k_w, (out_channels, in_channels, self.kh, self.kw), jnp.float32)
        # BatchNorm2d parameters + running stats (eval-mode semantics)
        self.gamma = 1.0 + 0.1 * jax.random.normal(k_g, (out_channels,), jnp.float32)
        self.beta = 0.1 * jax.random.normal(k_b, (out_channels,), jnp.float32)
        self.running_mean = 0.1 * jax.random.normal(k_m, (out_channels,), jnp.float32)
        self.running_var = jnp.abs(
            1.0 + 0.1 * jax.random.normal(k_v, (out_channels,), jnp.float32))

    def __call__(self, x):
        # x: (N, C_in, H, W) float32 (NCHW, PyTorch convention)
        return _fused_conv_bn_relu(
            x, self.weight, self.gamma, self.beta,
            self.running_mean, self.running_var,
            stride=self.stride, padding=self.padding, eps=self.eps)


# --------------------------- reference (pure JAX) -------------------------- #
def _reference(module, x):
    out = lax.conv_general_dilated(
        x, module.weight,
        window_strides=(module.stride, module.stride),
        padding=[(module.padding, module.padding)] * 2,
        dimension_numbers=("NCHW", "OIHW", "NCHW"))
    scale = module.gamma / jnp.sqrt(module.running_var + module.eps)
    shift = module.beta - module.running_mean * scale
    out = out * scale[None, :, None, None] + shift[None, :, None, None]
    return jnp.maximum(out, 0.0)


if __name__ == "__main__":
    key = jax.random.PRNGKey(0)
    k_x, k_p = jax.random.split(key)

    # Small shapes: batch=2, in_channels=4, spatial=16x16, out_channels=8, 3x3.
    x = jax.random.normal(k_x, (2, 4, 16, 16), jnp.float32)

    module = BasicConv2dPallas(in_channels=4, out_channels=8,
                               kernel_size=3, stride=1, padding=1, key=k_p)

    out = jax.block_until_ready(jax.jit(module.__call__)(x))
    ref = jax.block_until_ready(_reference(module, x))

    # bf16 matmul inputs + bf16 output store (f32 accumulation) -> looser
    # tolerance than pure f32.
    np.testing.assert_allclose(np.asarray(out), np.asarray(ref),
                               rtol=2e-2, atol=2e-2)
    print("KERNEL_OK")
</pallas_src>

<mosaic_0001>
module attributes {stable_mosaic.version = 11 : i64} {
  func.func @_conv_bn_relu_kernel(%arg0: i32, %arg1: i32, %arg2: memref<1x18x18x4xbf16, #tpu.memory_space<vmem>>, %arg3: memref<36x128xbf16, #tpu.memory_space<vmem>>, %arg4: memref<1x128xf32, #tpu.memory_space<vmem>>, %arg5: memref<1x128x128xbf16, #tpu.memory_space<vmem>>) attributes {dimension_semantics = [#tpu.dimension_semantics<parallel>, #tpu.dimension_semantics<parallel>], iteration_bounds = array<i64: 2, 2>, scalar_prefetch = 0 : i64, scratch_operands = 0 : i64, tpu.core_type = #tpu.core_type<tc>, window_params = [{transform_indices = @transform_0, window_bounds = array<i64: 1, 18, 18, 4>}, {pipeline_mode = #tpu.pipeline_mode<synchronous>, transform_indices = @transform_1, window_bounds = array<i64: 36, 128>}, {pipeline_mode = #tpu.pipeline_mode<synchronous>, transform_indices = @transform_2, window_bounds = array<i64: 1, 128>}, {transform_indices = @transform_3, window_bounds = array<i64: 1, 128, 128>}]} {
    %c8_i32 = arith.constant 8 : i32
    %0 = arith.muli %arg1, %c8_i32 : i32
    %c1_i32 = arith.constant 1 : i32
    %1 = arith.muli %0, %c1_i32 : i32
    %c0_i32 = arith.constant 0 : i32
    %2 = arith.addi %1, %c0_i32 : i32
    %c0 = arith.constant 0 : index
    %3 = arith.index_cast %2 : i32 to index
    %c0_0 = arith.constant 0 : index
    %c0_1 = arith.constant 0 : index
    %4 = vector.load %arg2[%c0, %3, %c0_0, %c0_1] : memref<1x18x18x4xbf16, #tpu.memory_space<vmem>>, vector<1x8x16x4xbf16>
    %5 = vector.shape_cast %4 : vector<1x8x16x4xbf16> to vector<8x16x4xbf16>
    %6 = vector.shape_cast %5 : vector<8x16x4xbf16> to vector<128x4xbf16>
    %c0_i32_2 = arith.constant 0 : i32
    %7 = arith.addi %1, %c0_i32_2 : i32
    %c0_3 = arith.constant 0 : index
    %8 = arith.index_cast %7 : i32 to index
    %c1 = arith.constant 1 : index
    %c0_4 = arith.constant 0 : index
    %9 = vector.load %arg2[%c0_3, %8, %c1, %c0_4] : memref<1x18x18x4xbf16, #tpu.memory_space<vmem>>, vector<1x8x16x4xbf16>
    %10 = vector.shape_cast %9 : vector<1x8x16x4xbf16> to vector<8x16x4xbf16>
    %11 = vector.shape_cast %10 : vector<8x16x4xbf16> to vector<128x4xbf16>
    %c0_i32_5 = arith.constant 0 : i32
    %12 = arith.addi %1, %c0_i32_5 : i32
    %c0_6 = arith.constant 0 : index
    %13 = arith.index_cast %12 : i32 to index
    %c2 = arith.constant 2 : index
    %c0_7 = arith.constant 0 : index
    %14 = vector.load %arg2[%c0_6, %13, %c2, %c0_7] : memref<1x18x18x4xbf16, #tpu.memory_space<vmem>>, vector<1x8x16x4xbf16>
    %15 = vector.shape_cast %14 : vector<1x8x16x4xbf16> to vector<8x16x4xbf16>
    %16 = vector.shape_cast %15 : vector<8x16x4xbf16> to vector<128x4xbf16>
    %c1_i32_8 = arith.constant 1 : i32
    %17 = arith.addi %1, %c1_i32_8 : i32
    %c0_9 = arith.constant 0 : index
    %18 = arith.index_cast %17 : i32 to index
    %c0_10 = arith.constant 0 : index
    %c0_11 = arith.constant 0 : index
    %19 = vector.load %arg2[%c0_9, %18, %c0_10, %c0_11] : memref<1x18x18x4xbf16, #tpu.memory_space<vmem>>, vector<1x8x16x4xbf16>
    %20 = vector.shape_cast %19 : vector<1x8x16x4xbf16> to vector<8x16x4xbf16>
    %21 = vector.shape_cast %20 : vector<8x16x4xbf16> to vector<128x4xbf16>
    %c1_i32_12 = arith.constant 1 : i32
    %22 = arith.addi %1, %c1_i32_12 : i32
    %c0_13 = arith.constant 0 : index
    %23 = arith.index_cast %22 : i32 to index
    %c1_14 = arith.constant 1 : index
    %c0_15 = arith.constant 0 : index
    %24 = vector.load %arg2[%c0_13, %23, %c1_14, %c0_15] : memref<1x18x18x4xbf16, #tpu.memory_space<vmem>>, vector<1x8x16x4xbf16>
    %25 = vector.shape_cast %24 : vector<1x8x16x4xbf16> to vector<8x16x4xbf16>
    %26 = vector.shape_cast %25 : vector<8x16x4xbf16> to vector<128x4xbf16>
    %c1_i32_16 = arith.constant 1 : i32
    %27 = arith.addi %1, %c1_i32_16 : i32
    %c0_17 = arith.constant 0 : index
    %28 = arith.index_cast %27 : i32 to index
    %c2_18 = arith.constant 2 : index
    %c0_19 = arith.constant 0 : index
    %29 = vector.load %arg2[%c0_17, %28, %c2_18, %c0_19] : memref<1x18x18x4xbf16, #tpu.memory_space<vmem>>, vector<1x8x16x4xbf16>
    %30 = vector.shape_cast %29 : vector<1x8x16x4xbf16> to vector<8x16x4xbf16>
    %31 = vector.shape_cast %30 : vector<8x16x4xbf16> to vector<128x4xbf16>
    %c2_i32 = arith.constant 2 : i32
    %32 = arith.addi %1, %c2_i32 : i32
    %c0_20 = arith.constant 0 : index
    %33 = arith.index_cast %32 : i32 to index
    %c0_21 = arith.constant 0 : index
    %c0_22 = arith.constant 0 : index
    %34 = vector.load %arg2[%c0_20, %33, %c0_21, %c0_22] : memref<1x18x18x4xbf16, #tpu.memory_space<vmem>>, vector<1x8x16x4xbf16>
    %35 = vector.shape_cast %34 : vector<1x8x16x4xbf16> to vector<8x16x4xbf16>
    %36 = vector.shape_cast %35 : vector<8x16x4xbf16> to vector<128x4xbf16>
    %c2_i32_23 = arith.constant 2 : i32
    %37 = arith.addi %1, %c2_i32_23 : i32
    %c0_24 = arith.constant 0 : index
    %38 = arith.index_cast %37 : i32 to index
    %c1_25 = arith.constant 1 : index
    %c0_26 = arith.constant 0 : index
    %39 = vector.load %arg2[%c0_24, %38, %c1_25, %c0_26] : memref<1x18x18x4xbf16, #tpu.memory_space<vmem>>, vector<1x8x16x4xbf16>
    %40 = vector.shape_cast %39 : vector<1x8x16x4xbf16> to vector<8x16x4xbf16>
    %41 = vector.shape_cast %40 : vector<8x16x4xbf16> to vector<128x4xbf16>
    %c2_i32_27 = arith.constant 2 : i32
    %42 = arith.addi %1, %c2_i32_27 : i32
    %c0_28 = arith.constant 0 : index
    %43 = arith.index_cast %42 : i32 to index
    %c2_29 = arith.constant 2 : index
    %c0_30 = arith.constant 0 : index
    %44 = vector.load %arg2[%c0_28, %43, %c2_29, %c0_30] : memref<1x18x18x4xbf16, #tpu.memory_space<vmem>>, vector<1x8x16x4xbf16>
    %45 = vector.shape_cast %44 : vector<1x8x16x4xbf16> to vector<8x16x4xbf16>
    %46 = vector.shape_cast %45 : vector<8x16x4xbf16> to vector<128x4xbf16>
    %47 = tpu.concatenate %6, %11, %16, %21, %26, %31, %36, %41, %46 in 1 : vector<128x4xbf16>, vector<128x4xbf16>, vector<128x4xbf16>, vector<128x4xbf16>, vector<128x4xbf16>, vector<128x4xbf16>, vector<128x4xbf16>, vector<128x4xbf16>, vector<128x4xbf16> -> vector<128x36xbf16>
    %c0_31 = arith.constant 0 : index
    %c0_32 = arith.constant 0 : index
    %48 = vector.load %arg3[%c0_31, %c0_32] : memref<36x128xbf16, #tpu.memory_space<vmem>>, vector<36x128xbf16>
    %cst = arith.constant dense<0.000000e+00> : vector<128x128xf32>
    %49 = tpu.matmul %47, %48, %cst {dimension_numbers = #tpu.dot_dimension_numbers<[1], [0], [0], [1], [0, 0, 1, 1], [], []>} : vector<128x36xbf16>, vector<36x128xbf16>, vector<128x128xf32> -> vector<128x128xf32>
    %c0_33 = arith.constant 0 : index
    %c0_34 = arith.constant 0 : index
    %50 = vector.load %arg4[%c0_33, %c0_34] : memref<1x128xf32, #tpu.memory_space<vmem>>, vector<1x128xf32>
    %51 = vector.broadcast %50 : vector<1x128xf32> to vector<128x128xf32>
    %52 = arith.addf %49, %51 : vector<128x128xf32>
    %cst_35 = arith.constant 0.000000e+00 : f32
    %53 = vector.broadcast %cst_35 : f32 to vector<128x128xf32>
    %54 = arith.maximumf %52, %53 : vector<128x128xf32>
    %55 = arith.truncf %54 : vector<128x128xf32> to vector<128x128xbf16>
    %c0_36 = arith.constant 0 : index
    %c0_37 = arith.constant 0 : index
    %c0_38 = arith.constant 0 : index
    %56 = vector.load %arg5[%c0_36, %c0_37, %c0_38] : memref<1x128x128xbf16, #tpu.memory_space<vmem>>, vector<1x128x128xbf16>
    %57 = vector.shape_cast %56 : vector<1x128x128xbf16> to vector<128x128xbf16>
    %58 = vector.shape_cast %55 : vector<128x128xbf16> to vector<1x128x128xbf16>
    tpu.vector_store %arg5[%c0_36, %c0_37, %c0_38], %58 {strides = array<i32>} : memref<1x128x128xbf16, #tpu.memory_space<vmem>>, vector<1x128x128xbf16>,
    return
  }
  func.func @transform_0(%arg0: i32, %arg1: i32) -> (i32, i32, i32, i32) {
    %c0_i32 = arith.constant 0 : i32
    %c0_i32_0 = arith.constant 0 : i32
    %c0_i32_1 = arith.constant 0 : i32
    %c0_i32_2 = arith.constant 0 : i32
    return %arg0, %c0_i32, %c0_i32_0, %c0_i32_1 : i32, i32, i32, i32
  }
  func.func @transform_1(%arg0: i32, %arg1: i32) -> (i32, i32) {
    %c0_i32 = arith.constant 0 : i32
    %c0_i32_0 = arith.constant 0 : i32
    %c0_i32_1 = arith.constant 0 : i32
    return %c0_i32, %c0_i32_0 : i32, i32
  }
  func.func @transform_2(%arg0: i32, %arg1: i32) -> (i32, i32) {
    %c0_i32 = arith.constant 0 : i32
    %c0_i32_0 = arith.constant 0 : i32
    %c0_i32_1 = arith.constant 0 : i32
    return %c0_i32, %c0_i32_0 : i32, i32
  }
  func.func @transform_3(%arg0: i32, %arg1: i32) -> (i32, i32, i32) {
    %c0_i32 = arith.constant 0 : i32
    %c0_i32_0 = arith.constant 0 : i32
    return %arg0, %arg1, %c0_i32 : i32, i32, i32
  }
}

</mosaic_0001>

<bundles_post_ra>
// kernel: a_call__.1
= control target key start
LH: loop header
LB: loop body
LE: loop exit
PB: predicated region body
PF: predicated region fallthrough
CT: control target
= control target key end

     0   :  { %s2438_s12 = smov 0   ;;  %s2440_s13 = smov 0   ;;  %s3333_s0 = inlined_call_operand.vmem [shape: bf16[2,18,18,4], index: 0, kind: input, shape index: {}]   ;;  %s3334_s1 = inlined_call_operand.vmem [shape: bf16[36,128], index: 1, kind: input, shape index: {}]   ;;  %s3335_s2 = inlined_call_operand.vmem [shape: f32[1,128], index: 2, kind: input, shape index: {}]   ;;  %s3336_s3 = inlined_call_operand.vmem [shape: bf16[2,256,128], index: 3, kind: output, shape index: {}]  }
   0x1   :  { %s2442_s14 = smov 0   ;;  %s2444_s15 = smov 0  }
   0x2   :  { %s2446_s16 = smov 0  }
   0x3 LB: > { %s22_s17 = sadd.s32 1, %s2400_s14  ;;  %s25_s18 = sadd.s32 1, %s2404_s15  ;;  %s2408_s16 = sphi %s2446_s16, %s13_s16   ;;  %s2404_s15 = sphi %s2444_s15, %s3344_s15   ;;  %s2400_s14 = sphi %s2442_s14, %s3343_s14   ;;  %s2396_s13 = sphi %s2440_s13, %s3342_s13   ;;  %s2392_s12 = sphi %s2438_s12, %s3341_s12  }
   0x4   : > { %p23_p0 = scmp.ge.s32.totalorder %s22_s17, 2  ;;  %p1976_p1 = scmp.ge.s32.totalorder %s2408_s16, 1 }
   0x5   : > { %p151_p2 = scmp.lt.s32.totalorder %s2408_s16, 5 }
   0x6   : > { %s3346_s17 = smov (%p23_p0, %s22_s17), 0  ;;  %s3348_s18 = smov (!%p23_p0, %s25_s18), %s2404_s15 }
   0x7   : > { %p152_p3 = pnand %p1976_p1, %p151_p2  ;;  %p27_p4 = scmp.ge.s32.totalorder %s3348_s18, 2 }
   0x8   : > { %p179_p5 = scmp.lt.s32.totalorder (!%p152_p3), %s2396_s13, 1  ;;  %s2178_s19 = smul.u32 (!%p152_p3), 96, %s2392_s12  ;;  %vm450_vm0 = vcmask (!%p152_p3), 1042432   ;;  %vm451_vm1 = vcmask (!%p152_p3), 1046532   ;;  %vm223_vm3 = vsmask.f32 (!%p152_p3), 3328 }
   0x9   : > { %s3350_s18 = smov (%p27_p4, %s3348_s18), 0  ;;  %155 = sbr.rel (%p152_p3) target bundleno = 514 (0x202), region = 32 }
   0xa   : > { %s2410_s25 = smov (!%p152_p3), 12   ;;  %vm2525_vm2 = vmor (!%p152_p3), %vm450_vm0, %vm451_vm1  ;;  %vm224_vm4 = vsmask.f32 (!%p152_p3), 7440  ;;  %s2411_s26 = smov (!%p152_p3), 8   ;;  %vm1681_vm6 = vcmask (!%p152_p3), 1041408   ;;  %vm1493_vm7 = vcmask (!%p152_p3), 31744  }
   0xb   : > { %vm2591_vm5 = vmor (!%p152_p3), %vm223_vm3, %vm224_vm4  ;;  %s2412_s27 = smov (!%p152_p3), 4   ;;  %s2413_s28 = smov (!%p152_p3), 16   ;;  %vm1518_vm8 = vcmask (!%p152_p3), 64512   ;;  %vm1535_vm9 = vcmask (!%p152_p3), 97280   ;;  %vm1552_vm10 = vcmask (!%p152_p3), 130048   ;;  %vm1569_vm11 = vcmask (!%p152_p3), 162816  }
   0xc   : > { %s2414_s29 = smov (!%p152_p3), 20   ;;  %s2415_s30 = smov (!%p152_p3), 24   ;;  %vm1586_vm12 = vcmask (!%p152_p3), 195584   ;;  %vm1603_vm13 = vcmask (!%p152_p3), 228352   ;;  %vm1620_vm14 = vcmask (!%p152_p3), 261120   ;;  %vm1664_vm15 = vcmask (!%p152_p3), 293888  }
   0xd   : > { %s2416_s8 = smov (!%p152_p3), 28   ;;  %s2417_s9 = smov (!%p152_p3), 32  }
  0x10   : > { %s3352_s13 = smov (!%p179_p5, %s2396_s13), 1 }
  0x11   : > { %s2283_s20 = smul.u32 216, %s3352_s13 }
  0x13   : > { %s183_s23 = scalar_lea.vmem %s3333_s0, %s2283_s20  ;;  %s1979_s20 = sshll.u32 %s3352_s13, 5 }
  0x14   : > { %s2477_s24 = scalar_lea.vmem %s183_s23, %s2178_s19  ;;  %s1978_s19 = sshll.u32 %s2392_s12, 4 }
  0x15   : > { %v2002_v0 = vld [vmem:[%s2477_s24 + $0x3c] sm:$0xf]  ;;  %v2481_v1 = vld [vmem:[%s2477_s24 + $0x40] sm:$0xf]  ;;  %v1994_v2 = vld [vmem:[%s2477_s24 + $0xc] sm:$0xf] }
  0x16   : > { %v643_v3 = vshll.u32 %v2481_v1, 16  ;;  %v647_v4 = vshrl.u32 %v2481_v1, 16  ;;  %v2104_v5 = vcombine.low %v2002_v0, %v2481_v1  ;;  %v634_v6 = vshrl.u32 %v2002_v0, 16  ;;  %v2488_v7 = vld [vmem:[%s2477_s24 + $0x10] sm:$0xf]  ;;  %p187_p6 = scmp.lt.s32.totalorder %s1978_s19, 31 }
  0x17   : > { %v637_v8 = vshll.u32 %v2002_v0, 16  ;;  %v547_v9 = vshll.u32 %v2488_v7, 16  ;;  %v551_v10 = vshrl.u32 %v2488_v7, 16  ;;  %v2100_v11 = vcombine.low %v1994_v2, %v2488_v7  ;;  %v2004_v12 = vld [vmem:[%s2477_s24 + $0x48] sm:$0xf] }
  0x18   : > { %v2494_v13 = vrot.slane %v647_v4, 4  ;;  %1277 = vrot.lane.b32.xlu1 %v2104_v5, %s2410_s25  ;;  %v636_v14 = vrot.slane %v634_v6, 4  ;;  %v538_v15 = vshrl.u32 %v1994_v2, 16  ;;  %v541_v16 = vshll.u32 %v1994_v2, 16  ;;  %v2498_v17 = vld [vmem:[%s2477_s24 + $0x4c] sm:$0xf] }
  0x19   : > { %v639_v18 = vrot.slane %v637_v8, 5  ;;  %v2500_v19 = vrot.slane %v551_v10, 4  ;;  %1269 = vrot.lane.b32.xlu0 %v2100_v11, %s2410_s25  ;;  %v658_v20 = vshrl.u32 %v2004_v12, 16  ;;  %v661_v21 = vshll.u32 %v2004_v12, 16  ;;  %v1996_v22 = vld [vmem:[%s2477_s24 + $0x18] sm:$0xf] }
  0x1a   : > { %v540_v23 = vrot.slane %v538_v15, 4  ;;  %v543_v24 = vrot.slane %v541_v16, 5  ;;  %v671_v25 = vshrl.u32 %v2498_v17, 16  ;;  %v2105_v26 = vcombine.low %v2004_v12, %v2498_v17  ;;  %v2507_v27 = vld [vmem:[%s2477_s24 + $0x1c] sm:$0xf]  ;;  %s3354_s19 = smov (!%p187_p6, %s1978_s19), 31 }
  0x1b   : > { %v640_v28 = vor.u32 %v639_v18, %v636_v14  ;;  %v2509_v29 = vrot.slane %v658_v20, 4  ;;  %v2511_v30 = vrot.slane %v661_v21, 5  ;;  %v562_v31 = vshrl.u32 %v1996_v22, 16  ;;  %v2514_v32 = vld [vmem:[%s2477_s24 + $0x34] sm:$0xf]  ;;  %s190_s23 = sadd.s32 %s1979_s20, %s3354_s19 }
  0x1c   : > { %v544_v33 = vor.u32 %v543_v24, %v540_v23  ;;  %1279 = vrot.lane.b32.xlu1 %v2105_v26, %s2410_s25  ;;  %v565_v34 = vshll.u32 %v1996_v22, 16  ;;  %v575_v35 = vshrl.u32 %v2507_v27, 16  ;;  %v2101_v36 = vcombine.low %v1996_v22, %v2507_v27  ;;  %v2520_v37 = vld [vmem:[%s2477_s24 + $0x38] sm:$0x1]  ;;  %v422_v38 = vld [vmem:[%s2477_s24 + $0x30] sm:$0xe] }
  0x1d   : > { %v2529_v40 = vrot.slane %v640_v28, 4  ;;  %v2531_v41 = vrot.slane %v562_v31, 4  ;;  %v1988_v42 = vrot.slane %v422_v38, 9  ;;  %v483_v43 = vrot.slane %v2514_v32, 5  ;;  %v2535_v44 = vld [vmem:[%s2477_s24 + $0x4] sm:$0xf] }
  0x1e   : > { %v2537_v45 = vrot.slane %v544_v33, 4  ;;  %v2539_v46 = vrot.slane %v565_v34, 5  ;;  %1271 = vrot.lane.b32.xlu0 %v2101_v36, %s2410_s25  ;;  %v486_v47 = vrot.slane %v2520_v37, 5  ;;  %v2544_v48 = vld [vmem:[%s2477_s24 + $0x8] sm:$0x1]  ;;  %v455_v49 = vrot.slane %v2535_v44, 5 }
  0x1f   : > { %v484_v50 = vsel %vm2525_vm2, %v1988_v42, %v483_v43  ;;  %v485_v51 = vrot.slane %v483_v43, 4  ;;  %v418_v52 = vld [vmem:[%s2477_s24] sm:$0xe]  ;;  %v458_v53 = vrot.slane %v2544_v48, 5  ;;  %v2555_v57 = vld [vmem:[%s2477_s24 + $0x44] sm:$0x1]  ;;  %v664_v59 = vor.u32 %v2511_v30, %v2509_v29 }
  0x20   : > { %v2552_v54 = vld [vmem:[%s2477_s24 + $0x40] sm:$0xf]  ;;  %v1984_v55 = vrot.slane %v418_v52, 9  ;;  %v457_v56 = vrot.slane %v455_v49, 4  ;;  %v423_v58 = vld [vmem:[%s2477_s24 + $0x3c] sm:$0xe]  ;;  %v568_v60 = vor.u32 %v2539_v46, %v2531_v41 }
  0x21   : > { %v487_v61 = vsel %vm2525_vm2, %v485_v51, %v486_v47  ;;  %v1989_v62 = vrot.slane %v423_v58, 9  ;;  %v490_v63 = vrot.slane %v2552_v54, 5  ;;  %v493_v0 = vrot.slane %v2555_v57, 5  ;;  %v202_v2 = vld [vmem:[%s2477_s24 + $0x10] sm:$0xf] }
  0x22   : > { %v2096_v4 = vcombine.low %v484_v50, %v487_v61  ;;  %v456_v5 = vsel %vm2525_vm2, %v1984_v55, %v455_v49  ;;  %v459_v6 = vsel %vm2525_vm2, %v457_v56, %v458_v53  ;;  %v216_v8 = vld [vmem:[%s2477_s24 + $0x14] sm:$0x1]  ;;  %v419_v10 = vld [vmem:[%s2477_s24 + $0xc] sm:$0xe]  ;;  %v462_v11 = vrot.slane %v202_v2, 5 }
  0x23   : > { %v2092_v12 = vcombine.low %v456_v5, %v459_v6  ;;  %v491_v14 = vsel %vm2525_vm2, %v1989_v62, %v490_v63  ;;  %v492_v15 = vrot.slane %v490_v63, 4  ;;  %v1985_v16 = vrot.slane %v419_v10, 9  ;;  %v201_v18 = vld [vmem:[%s2477_s24 + $0xc] sm:$0xf]  ;;  %v199_v33 = vld [vmem:[%s2477_s24] sm:$0xf] }
  0x24   : > { %1229 = vrot.lane.b32.xlu1 %v2096_v4, %s2411_s26  ;;  %v464_v20 = vrot.slane %v462_v11, 4  ;;  %v465_v21 = vrot.slane %v216_v8, 5  ;;  %v251_v22 = vshrl.u32 %v201_v18, 16  ;;  %v254_v23 = vshll.u32 %v201_v18, 16  ;;  %v209_v56 = vld [vmem:[%s2477_s24 + $0x3c] sm:$0xf] }
  0x25   : > { %1221 = vrot.lane.b32.xlu0 %v2092_v12, %s2411_s26  ;;  %v494_v24 = vsel %vm2525_vm2, %v492_v15, %v493_v0  ;;  %v463_v26 = vsel %vm2525_vm2, %v1985_v16, %v462_v11  ;;  %v260_v28 = vshll.u32 %v202_v2, 16  ;;  %v264_v31 = vshrl.u32 %v202_v2, 16 }
  0x26   : > { %v2097_v34 = vcombine.low %v491_v14, %v494_v24  ;;  %v466_v36 = vsel %vm2525_vm2, %v464_v20, %v465_v21  ;;  %v253_v38 = vrot.slane %v251_v22, 4  ;;  %v256_v42 = vrot.slane %v254_v23, 5  ;;  %v207_v20 = vld [vmem:[%s2477_s24 + $0x30] sm:$0xf] }
  0x27   : > { %v2093_v43 = vcombine.low %v463_v26, %v466_v36  ;;  %v262_v47 = vrot.slane %v260_v28, 5  ;;  %v266_v49 = vrot.slane %v264_v31, 4  ;;  %v270_v50 = vshll.u32 %v216_v8, 16 }
  0x28   : > { %1231 = vrot.lane.b32.xlu1 %v2097_v34, %s2411_s26  ;;  %v257_v51 = vor.u32 %v256_v42, %v253_v38  ;;  %v227_v52 = vshrl.u32 %v199_v33, 16  ;;  %v230_v53 = vshll.u32 %v199_v33, 16  ;;  %v236_v55 = vshll.u32 %v2535_v44, 16 }
  0x29   : > { %1223 = vrot.lane.b32.xlu0 %v2093_v43, %s2411_s26  ;;  %v267_v61 = vor.u32 %v266_v49, %v262_v47  ;;  %v272_v62 = vrot.slane %v270_v50, 5  ;;  %v240_v63 = vshrl.u32 %v2535_v44, 16  ;;  %v246_v0 = vshll.u32 %v2544_v48, 16 }
  0x2a   : > { %v258_v2 = vrot.slane %v257_v51, 4  ;;  %v229_v4 = vrot.slane %v227_v52, 4  ;;  %v232_v5 = vrot.slane %v230_v53, 5  ;;  %v238_v6 = vrot.slane %v236_v55, 5  ;;  %v2612_v52 = vld [vmem:[%s2477_s24 + $0x44] sm:$0x1] }
  0x2b   : > { %v268_v8 = vrot.slane %v267_v61, 4  ;;  %v242_v10 = vrot.slane %v240_v63, 4  ;;  %v248_v11 = vrot.slane %v246_v0, 5  ;;  %v347_v12 = vshrl.u32 %v209_v56, 16 }
  0x2c   : > { %v263_v14 = vsel %vm2591_vm5, %v258_v2, %v262_v47  ;;  %v233_v15 = vor.u32 %v232_v5, %v229_v4  ;;  %v350_v16 = vshll.u32 %v209_v56, 16  ;;  %v356_v18 = vshll.u32 %v2552_v54, 16 }
  0x2d   : > { %v273_v44 = vsel %vm2591_vm5, %v268_v8, %v272_v62  ;;  %v243_v48 = vor.u32 %v242_v10, %v238_v6  ;;  %v349_v21 = vrot.slane %v347_v12, 4  ;;  %v360_v22 = vshrl.u32 %v2552_v54, 16 }
  0x2e   : > { %v2085_v23 = vcombine.low %v263_v14, %v273_v44  ;;  %v234_v24 = vrot.slane %v233_v15, 4  ;;  %v352_v26 = vrot.slane %v350_v16, 5  ;;  %v358_v28 = vrot.slane %v356_v18, 5  ;;  %v2639_v44 = vld [vmem:[%s2477_s24 + $0x50] sm:$0x1] }
  0x2f   : > { %v244_v31 = vrot.slane %v243_v48, 4  ;;  %v362_v33 = vrot.slane %v360_v22, 4  ;;  %v366_v34 = vshll.u32 %v2555_v57, 16  ;;  %v323_v36 = vshrl.u32 %v207_v20, 16 }
  0x30   : > { %1183 = vrot.lane.b32.xlu1 %v2085_v23, %s2412_s27  ;;  %v239_v38 = vsel %vm2591_vm5, %v234_v24, %v238_v6  ;;  %v353_v42 = vor.u32 %v352_v26, %v349_v21  ;;  %v326_v43 = vshll.u32 %v207_v20, 16  ;;  %v332_v54 = vshll.u32 %v2514_v32, 16  ;;  %v2623_v6 = vld [vmem:[%s2477_s24 + $0x14] sm:$0x1] }
  0x31   : > { %v249_v47 = vsel %vm2591_vm5, %v244_v31, %v248_v11  ;;  %v363_v49 = vor.u32 %v362_v33, %v358_v28  ;;  %v368_v50 = vrot.slane %v366_v34, 5  ;;  %v325_v51 = vrot.slane %v323_v36, 4  ;;  %v2654_v31 = vld [vmem:[%s2477_s24 + $0x20] sm:$0x1]  ;;  %v2022_v34 = vld [vmem:[%s2477_s24 + $0x3c] sm:$0xe] }
  0x32   : > { %v2084_v57 = vcombine.low %v239_v38, %v249_v47  ;;  %v354_v53 = vrot.slane %v353_v42, 4  ;;  %v328_v55 = vrot.slane %v326_v43, 5  ;;  %v334_v56 = vrot.slane %v332_v54, 5  ;;  %v2018_v54 = vld [vmem:[%s2477_s24 + $0xc] sm:$0xe] }
  0x33   : > { %v364_v61 = vrot.slane %v363_v49, 4  ;;  %v336_v62 = vshrl.u32 %v2514_v32, 16  ;;  %v342_v63 = vshll.u32 %v2520_v37, 16  ;;  %v645_v0 = vrot.slane %v643_v3, 5 }
  0x34   : > { %1181 = vrot.lane.b32.xlu0 %v2084_v57, %s2412_s27  ;;  %v359_v2 = vsel %vm2591_vm5, %v354_v53, %v358_v28  ;;  %v329_v4 = vor.u32 %v328_v55, %v325_v51  ;;  %v653_v5 = vshll.u32 %v2612_v52, 16  ;;  %v549_v8 = vrot.slane %v547_v9, 5  ;;  %v2023_v53 = vld [vmem:[%s2477_s24 + $0x48] sm:$0xe] }
  0x35   : > { %v369_v32 = vsel %vm2591_vm5, %v364_v61, %v368_v50  ;;  %v338_v37 = vrot.slane %v336_v62, 4  ;;  %v344_v10 = vrot.slane %v342_v63, 5  ;;  %v646_v3 = vsel %vm2591_vm5, %v2529_v40, %v645_v0 }
  0x36   : > { %v2089_v11 = vcombine.low %v359_v2, %v369_v32  ;;  %v330_v12 = vrot.slane %v329_v4, 4  ;;  %v650_v14 = vor.u32 %v2494_v13, %v645_v0  ;;  %v655_v15 = vrot.slane %v653_v5, 5 }
  0x37   : > { %v339_v16 = vor.u32 %v338_v37, %v334_v56  ;;  %v550_v18 = vsel %vm2591_vm5, %v2537_v45, %v549_v8  ;;  %v554_v9 = vor.u32 %v2500_v19, %v549_v8  ;;  %v557_v20 = vshll.u32 %v2623_v6, 16 }
  0x38   : > { %1191 = vrot.lane.b32.xlu1 %v2089_v11, %s2412_s27  ;;  %v335_v40 = vsel %vm2591_vm5, %v330_v12, %v334_v56  ;;  %v651_v48 = vrot.slane %v650_v14, 4  ;;  %v665_v13 = vrot.slane %v664_v59, 4  ;;  %v667_v45 = vshll.u32 %v2498_v17, 16 }
  0x39   : > { %v340_v21 = vrot.slane %v339_v16, 4  ;;  %v555_v22 = vrot.slane %v554_v9, 4  ;;  %v559_v19 = vrot.slane %v557_v20, 5  ;;  %v673_v23 = vrot.slane %v671_v25, 4  ;;  %v2706_v20 = vld [vmem:[%s2477_s24 + $0x18] sm:$0xf] }
  0x3a   : > { %v656_v24 = vsel %vm2591_vm5, %v651_v48, %v655_v15  ;;  %v669_v26 = vrot.slane %v667_v45, 5  ;;  %v677_v28 = vshll.u32 %v2639_v44, 16  ;;  %v569_v29 = vrot.slane %v568_v60, 4  ;;  %v2699_v15 = vld [vmem:[%s2477_s24 + $0x4c] sm:$0xf] }
  0x3b   : > { %v345_v30 = vsel %vm2591_vm5, %v340_v21, %v344_v10  ;;  %v2112_v59 = vcombine.low %v646_v3, %v656_v24  ;;  %v560_v33 = vsel %vm2591_vm5, %v555_v22, %v559_v19  ;;  %v571_v25 = vshll.u32 %v2507_v27, 16  ;;  %v2712_v45 = vld [vmem:[%s2477_s24 + $0x1c] sm:$0xf] }
  0x3c   : > { %v2088_v36 = vcombine.low %v335_v40, %v345_v30  ;;  %v2108_v38 = vcombine.low %v550_v18, %v560_v33  ;;  %v670_v42 = vsel %vm2591_vm5, %v665_v13, %v669_v26  ;;  %v674_v43 = vor.u32 %v673_v23, %v669_v26  ;;  %v2722_v23 = vld [vmem:[%s2477_s24 + $0x54] sm:$0xf] }
  0x3d   : > { %1317 = vrot.lane.b32.xlu1 %v2112_v59, %s2413_s28  ;;  %v679_v41 = vrot.slane %v677_v28, 5  ;;  %v573_v46 = vrot.slane %v571_v25, 5  ;;  %v577_v60 = vrot.slane %v575_v35, 4  ;;  %v581_v47 = vshll.u32 %v2654_v31, 16 }
  0x3e   : > { %1189 = vrot.lane.b32.xlu0 %v2088_v36, %s2412_s27  ;;  %v675_v49 = vrot.slane %v674_v43, 4  ;;  %v2030_v50 = vrot.slane %v2022_v34, 9  ;;  %v791_v51 = vrot.slane %v2481_v1, 5  ;;  %v794_v57 = vrot.slane %v2612_v52, 5  ;;  %v2019_v1 = vld [vmem:[%s2477_s24 + $0x18] sm:$0xe] }
  0x3f   : > { %v574_v55 = vsel %vm2591_vm5, %v569_v29, %v573_v46  ;;  %v578_v56 = vor.u32 %v577_v60, %v573_v46  ;;  %v583_v61 = vrot.slane %v581_v47, 5  ;;  %v2026_v62 = vrot.slane %v2018_v54, 9  ;;  %v2728_v29 = vld [vmem:[%s2477_s24 + $0x58] sm:$0xf]  ;;  %v2734_v34 = vld [vmem:[%s2477_s24 + $0x24] sm:$0xf] }
  0x40   : > { %v680_v35 = vsel %vm2591_vm5, %v675_v49, %v679_v41  ;;  %v792_v63 = vsel %vm2525_vm2, %v2030_v50, %v791_v51  ;;  %v793_v0 = vrot.slane %v791_v51, 4  ;;  %v763_v2 = vrot.slane %v2488_v7, 5  ;;  %v2692_v7 = vld [vmem:[%s2477_s24 + $0x48] sm:$0xf]  ;;  %v2748_v49 = vld [vmem:[%s2477_s24 + $0x50] sm:$0x1] }
  0x41   : > { %v2113_v52 = vcombine.low %v670_v42, %v680_v35  ;;  %v579_v4 = vrot.slane %v578_v56, 4  ;;  %v766_v5 = vrot.slane %v2623_v6, 5  ;;  %v2031_v8 = vrot.slane %v2023_v53, 9  ;;  %v2743_v54 = vld [vmem:[%s2477_s24 + $0x28] sm:$0xf] }
  0x42   : > { %1309 = vrot.lane.b32.xlu0 %v2108_v38, %s2413_s28  ;;  %v795_v32 = vsel %vm2525_vm2, %v793_v0, %v794_v57  ;;  %v764_v37 = vsel %vm2525_vm2, %v2026_v62, %v763_v2  ;;  %v765_v10 = vrot.slane %v763_v2, 4  ;;  %v798_v3 = vrot.slane %v2498_v17, 5  ;;  %v2759_v35 = vld [vmem:[%s2477_s24 + $0x20] sm:$0x1] }
  0x43   : > { %1319 = vrot.lane.b32.xlu1 %v2113_v52, %s2413_s28  ;;  %v584_v6 = vsel %vm2591_vm5, %v579_v4, %v583_v61  ;;  %v2120_v11 = vcombine.low %v792_v63, %v795_v32  ;;  %v801_v12 = vrot.slane %v2639_v44, 5  ;;  %v2027_v14 = vrot.slane %v2019_v1, 9 }
  0x44   : > { %v2109_v16 = vcombine.low %v574_v55, %v584_v6  ;;  %v767_v18 = vsel %vm2525_vm2, %v765_v10, %v766_v5  ;;  %v799_v17 = vsel %vm2525_vm2, %v2031_v8, %v798_v3  ;;  %v800_v9 = vrot.slane %v798_v3, 4 }
  0x45   : > { %v2116_v40 = vcombine.low %v764_v37, %v767_v18  ;;  %v770_v48 = vrot.slane %v2507_v27, 5  ;;  %v773_v44 = vrot.slane %v2654_v31, 5  ;;  %v942_v13 = vshrl.u32 %v2692_v7, 16 }
  0x46   : > { %1311 = vrot.lane.b32.xlu0 %v2109_v16, %s2413_s28  ;;  %v802_v21 = vsel %vm2525_vm2, %v800_v9, %v801_v12  ;;  %v945_v22 = vshll.u32 %v2692_v7, 16  ;;  %v955_v19 = vshrl.u32 %v2699_v15, 16  ;;  %v2128_v27 = vcombine.low %v2692_v7, %v2699_v15 }
  0x47   : > { %1357 = vrot.lane.b32.xlu1 %v2120_v11, %s2414_s29  ;;  %v2121_v24 = vcombine.low %v799_v17, %v802_v21  ;;  %v771_v26 = vsel %vm2525_vm2, %v2027_v14, %v770_v48  ;;  %v772_v28 = vrot.slane %v770_v48, 4  ;;  %v944_v31 = vrot.slane %v942_v13, 4  ;;  %v2768_v11 = vld [vmem:[%s2477_s24 + $0x5c] sm:$0x1] }
  0x48   : > { %v947_v30 = vrot.slane %v945_v22, 5  ;;  %v846_v59 = vshrl.u32 %v2706_v20, 16  ;;  %v849_v33 = vshll.u32 %v2706_v20, 16  ;;  %v859_v25 = vshrl.u32 %v2712_v45, 16  ;;  %v2779_v22 = vld [vmem:[%s2477_s24 + $0x2c] sm:$0x1] }
  0x49   : > { %v774_v36 = vsel %vm2525_vm2, %v772_v28, %v773_v44  ;;  %v2124_v38 = vcombine.low %v2706_v20, %v2712_v45  ;;  %v966_v42 = vshrl.u32 %v2722_v23, 16  ;;  %v969_v43 = vshll.u32 %v2722_v23, 16 }
  0x4a   : > { %1349 = vrot.lane.b32.xlu0 %v2116_v40, %s2414_s29  ;;  %v2117_v41 = vcombine.low %v771_v26, %v774_v36  ;;  %v848_v46 = vrot.slane %v846_v59, 4  ;;  %v851_v60 = vrot.slane %v849_v33, 5  ;;  %v979_v47 = vshrl.u32 %v2728_v29, 16  ;;  %v2353_v36 = vld [vmem:[%s3334_s1 + $0x8] sm:$0xff]  }
  0x4b   : > { %1359 = vrot.lane.b32.xlu1 %v2121_v24, %s2414_s29  ;;  %v968_v50 = vrot.slane %v966_v42, 4  ;;  %v971_v51 = vrot.slane %v969_v43, 5  ;;  %v2129_v57 = vcombine.low %v2722_v23, %v2728_v29  ;;  %v870_v53 = vshrl.u32 %v2734_v34, 16  ;;  %v2352_v23 = vld [vmem:[%s3334_s1] sm:$0xff]  }
  0x4c   : > { %v873_v55 = vshll.u32 %v2734_v34, 16  ;;  %v883_v56 = vshrl.u32 %v2743_v54, 16  ;;  %v2125_v61 = vcombine.low %v2734_v34, %v2743_v54  ;;  %v948_v62 = vor.u32 %v947_v30, %v944_v31  ;;  %v2064_v30 = vld [vmem:[%s2477_s24 + $0x48] sm:$0xe]  ;;  %2253 = vmatprep.subr.bf16.mxu0 %v2352_v23  ;;  %2275 = vmatprep.subr.bf16.mxu1 %v2352_v23 }
  0x4d   : > { %v872_v63 = vrot.slane %v870_v53, 4  ;;  %v951_v0 = vshll.u32 %v2699_v15, 16  ;;  %v957_v2 = vrot.slane %v955_v19, 4  ;;  %v961_v1 = vshll.u32 %v2748_v49, 16  ;;  %2254 = vmatpush3.bf16.msra.mxu0 %v2352_v23  ;;  %2278 = vmatpush3.bf16.msra.mxu1 %v2352_v23  ;;  %v2065_v23 = vld [vmem:[%s2477_s24 + $0x54] sm:$0xe] }
  0x4e   : > { %1351 = vrot.lane.b32.xlu0 %v2117_v41, %s2414_s29  ;;  %v875_v52 = vrot.slane %v873_v55, 5  ;;  %v949_v4 = vrot.slane %v948_v62, 4  ;;  %v852_v5 = vor.u32 %v851_v60, %v848_v46  ;;  %v855_v8 = vshll.u32 %v2712_v45, 16  ;;  %v2060_v46 = vld [vmem:[%s2477_s24 + $0x18] sm:$0xe]  ;;  %2255 = vmatprep.subr.bf16.mxu0 %v2353_v36 }
  0x4f   : > { %1405 = vrot.lane.b32.xlu1 %v2128_v27, %s2415_s30  ;;  %v953_v32 = vrot.slane %v951_v0, 5  ;;  %v963_v37 = vrot.slane %v961_v1, 5  ;;  %v861_v10 = vrot.slane %v859_v25, 4  ;;  %v865_v3 = vshll.u32 %v2759_v35, 16  ;;  %2276 = vmatprep.subr.bf16.mxu1 %v2353_v36  ;;  %v2808_v1 = vld [vmem:[%s2477_s24 + $0x4c] sm:$0xf] }
  0x50   : > { %v853_v7 = vrot.slane %v852_v5, 4  ;;  %v857_v6 = vrot.slane %v855_v8, 5  ;;  %v972_v12 = vor.u32 %v971_v51, %v968_v50  ;;  %v975_v14 = vshll.u32 %v2728_v29, 16 }
  0x51   : > { %v954_v16 = vsel %vm2591_vm5, %v949_v4, %v953_v32  ;;  %v958_v18 = vor.u32 %v957_v2, %v953_v32  ;;  %v867_v17 = vrot.slane %v865_v3, 5  ;;  %v981_v9 = vrot.slane %v979_v47, 4  ;;  %2256 = vmatpush3.bf16.msra.mxu0 %v2353_v36  ;;  %v2819_v32 = vld [vmem:[%s2477_s24 + $0x50] sm:$0x1]  ;;  %2279 = vmatpush3.bf16.msra.mxu1 %v2353_v36 }
  0x52   : > { %1397 = vrot.lane.b32.xlu0 %v2124_v38, %s2415_s30  ;;  %v858_v20 = vsel %vm2591_vm5, %v853_v7, %v857_v6  ;;  %v862_v40 = vor.u32 %v861_v10, %v857_v6  ;;  %v973_v48 = vrot.slane %v972_v12, 4  ;;  %v977_v44 = vrot.slane %v975_v14, 5  ;;  %v203_v10 = vld [vmem:[%s2477_s24 + $0x18] sm:$0xf]  ;;  %v2827_v12 = vld [vmem:[%s2477_s24 + $0x1c] sm:$0xf] }
  0x53   : > { %1407 = vrot.lane.b32.xlu1 %v2129_v57, %s2415_s30  ;;  %v959_v13 = vrot.slane %v958_v18, 4  ;;  %v985_v21 = vshll.u32 %v2768_v11, 16  ;;  %v876_v19 = vor.u32 %v875_v52, %v872_v63  ;;  %v879_v27 = vshll.u32 %v2743_v54, 16  ;;  %v211_v57 = vld [vmem:[%s2477_s24 + $0x48] sm:$0xf] }
  0x54   : > { %v863_v24 = vrot.slane %v862_v40, 4  ;;  %v978_v26 = vsel %vm2591_vm5, %v973_v48, %v977_v44  ;;  %v982_v28 = vor.u32 %v981_v9, %v977_v44  ;;  %v885_v31 = vrot.slane %v883_v56, 4  ;;  %v2833_v9 = vld [vmem:[%s2477_s24 + $0x20] sm:$0x1] }
  0x55   : > { %v964_v59 = vsel %vm2591_vm5, %v959_v13, %v963_v37  ;;  %v987_v33 = vrot.slane %v985_v21, 5  ;;  %v877_v25 = vrot.slane %v876_v19, 4  ;;  %v881_v34 = vrot.slane %v879_v27, 5 }
  0x56   : > { %1399 = vrot.lane.b32.xlu0 %v2125_v61, %s2415_s30  ;;  %v2136_v38 = vcombine.low %v954_v16, %v964_v59  ;;  %v868_v42 = vsel %vm2591_vm5, %v863_v24, %v867_v17  ;;  %v983_v43 = vrot.slane %v982_v28, 4  ;;  %v889_v41 = vshll.u32 %v2779_v22, 16 }
  0x57   : > { %v2132_v60 = vcombine.low %v858_v20, %v868_v42  ;;  %v882_v47 = vsel %vm2591_vm5, %v877_v25, %v881_v34  ;;  %v886_v50 = vor.u32 %v885_v31, %v881_v34  ;;  %v2072_v51 = vrot.slane %v2064_v30, 9  ;;  %v2061_v34 = vld [vmem:[%s2477_s24 + $0x24] sm:$0xe] }
  0x58   : > { %1445 = vrot.lane.b32.xlu1 %v2136_v38, %s2416_s8  ;;  %v988_v53 = vsel %vm2591_vm5, %v983_v43, %v987_v33  ;;  %v891_v55 = vrot.slane %v889_v41, 5  ;;  %v1099_v56 = vrot.slane %v2699_v15, 5  ;;  %v1102_v61 = vrot.slane %v2748_v49, 5 }
  0x59   : > { %v2137_v62 = vcombine.low %v978_v26, %v988_v53  ;;  %v887_v63 = vrot.slane %v886_v50, 4  ;;  %v2068_v0 = vrot.slane %v2060_v46, 9  ;;  %v1071_v2 = vrot.slane %v2712_v45, 5  ;;  %v2849_v50 = vld [vmem:[%s2477_s24 + $0x54] sm:$0xf] }
  0x5a   : > { %1437 = vrot.lane.b32.xlu0 %v2132_v60, %s2416_s8  ;;  %v1100_v52 = vsel %vm2525_vm2, %v2072_v51, %v1099_v56  ;;  %v1101_v4 = vrot.slane %v1099_v56, 4  ;;  %v1074_v15 = vrot.slane %v2759_v35, 5  ;;  %v371_v49 = vshrl.u32 %v211_v57, 16 }
  0x5b   : > { %v892_v5 = vsel %vm2591_vm5, %v887_v63, %v891_v55  ;;  %v1072_v8 = vsel %vm2525_vm2, %v2068_v0, %v1071_v2  ;;  %v1073_v45 = vrot.slane %v1071_v2, 4  ;;  %v374_v37 = vshll.u32 %v211_v57, 16  ;;  %v2858_v63 = vld [vmem:[%s2477_s24 + $0x58] sm:$0xf] }
  0x5c   : > { %1447 = vrot.lane.b32.xlu1 %v2137_v62, %s2416_s8  ;;  %v2133_v3 = vcombine.low %v882_v47, %v892_v5  ;;  %v1103_v35 = vsel %vm2525_vm2, %v1101_v4, %v1102_v61  ;;  %v373_v7 = vrot.slane %v371_v49, 4  ;;  %v380_v6 = vshll.u32 %v2808_v1, 16  ;;  %v2871_v5 = vld [vmem:[%s2477_s24 + $0x24] sm:$0xf] }
  0x5d   : > { %v2144_v14 = vcombine.low %v1100_v52, %v1103_v35  ;;  %v1075_v16 = vsel %vm2525_vm2, %v1073_v45, %v1074_v15  ;;  %v376_v18 = vrot.slane %v374_v37, 5  ;;  %v384_v17 = vshrl.u32 %v2808_v1, 16  ;;  %v2863_v52 = vld [vmem:[%s2477_s24 + $0x5c] sm:$0x1] }
  0x5e   : > { %1439 = vrot.lane.b32.xlu0 %v2133_v3, %s2416_s8  ;;  %v2140_v20 = vcombine.low %v1072_v8, %v1075_v16  ;;  %v382_v40 = vrot.slane %v380_v6, 5  ;;  %v390_v48 = vshll.u32 %v2819_v32, 16  ;;  %v275_v44 = vshrl.u32 %v203_v10, 16  ;;  %v2879_v3 = vld [vmem:[%s2477_s24 + $0x28] sm:$0xf] }
  0x5f   : > { %v377_v13 = vor.u32 %v376_v18, %v373_v7  ;;  %v386_v21 = vrot.slane %v384_v17, 4  ;;  %v278_v19 = vshll.u32 %v203_v10, 16  ;;  %v284_v27 = vshll.u32 %v2827_v12, 16  ;;  %v2886_v16 = vld [vmem:[%s2477_s24 + $0x2c] sm:$0x1] }
  0x60   : > { %1485 = vrot.lane.b32.xlu1 %v2144_v14, %s2417_s9  ;;  %v392_v24 = vrot.slane %v390_v48, 5  ;;  %v277_v26 = vrot.slane %v275_v44, 4  ;;  %v288_v28 = vshrl.u32 %v2827_v12, 16  ;;  %v294_v31 = vshll.u32 %v2833_v9, 16  ;;  %v424_v48 = vld [vmem:[%s2477_s24 + $0x48] sm:$0xe] }
  0x61   : > { %v378_v30 = vrot.slane %v377_v13, 4  ;;  %v387_v59 = vor.u32 %v386_v21, %v382_v40  ;;  %v280_v33 = vrot.slane %v278_v19, 5  ;;  %v286_v25 = vrot.slane %v284_v27, 5 }
  0x62   : > { %1477 = vrot.lane.b32.xlu0 %v2140_v20, %s2417_s9  ;;  %v290_v36 = vrot.slane %v288_v28, 4  ;;  %v296_v38 = vrot.slane %v294_v31, 5  ;;  %v2073_v42 = vrot.slane %v2065_v23, 9  ;;  %v1106_v43 = vrot.slane %v2728_v29, 5  ;;  %v420_v28 = vld [vmem:[%s2477_s24 + $0x18] sm:$0xe] }
  0x63   : > { %v383_v41 = vsel %vm2591_vm5, %v378_v30, %v382_v40  ;;  %v388_v46 = vrot.slane %v387_v59, 4  ;;  %v281_v60 = vor.u32 %v280_v33, %v277_v26  ;;  %v1109_v47 = vrot.slane %v2768_v11, 5 }
  0x64   : > { %v291_v51 = vor.u32 %v290_v36, %v286_v25  ;;  %v1107_v57 = vsel %vm2525_vm2, %v2073_v42, %v1106_v43  ;;  %v1108_v53 = vrot.slane %v1106_v43, 4  ;;  %v2069_v55 = vrot.slane %v2061_v34, 9 }
  0x65   : > { %v393_v29 = vsel %vm2591_vm5, %v388_v46, %v392_v24  ;;  %v282_v56 = vrot.slane %v281_v60, 4  ;;  %v1078_v61 = vrot.slane %v2743_v54, 5  ;;  %v1081_v62 = vrot.slane %v2779_v22, 5  ;;  %v425_v60 = vld [vmem:[%s2477_s24 + $0x54] sm:$0xe] }
  0x66   : > { %v2090_v11 = vcombine.low %v383_v41, %v393_v29  ;;  %v292_v0 = vrot.slane %v291_v51, 4  ;;  %v1110_v2 = vsel %vm2525_vm2, %v1108_v53, %v1109_v47  ;;  %v395_v4 = vshrl.u32 %v2849_v50, 16 }
  0x67   : > { %v287_v15 = vsel %vm2591_vm5, %v282_v56, %v286_v25  ;;  %v2145_v49 = vcombine.low %v1107_v57, %v1110_v2  ;;  %v1079_v54 = vsel %vm2525_vm2, %v2069_v55, %v1078_v61  ;;  %v1080_v22 = vrot.slane %v1078_v61, 4 }
  0x68   : > { %1193 = vrot.lane.b32.xlu1 %v2090_v11, %s2412_s27  ;;  %v297_v8 = vsel %vm2591_vm5, %v292_v0, %v296_v38  ;;  %v397_v45 = vrot.slane %v395_v4, 4  ;;  %v398_v37 = vshll.u32 %v2849_v50, 16  ;;  %v404_v10 = vshll.u32 %v2858_v63, 16 }
  0x69   : > { %v2086_v35 = vcombine.low %v287_v15, %v297_v8  ;;  %v1082_v7 = vsel %vm2525_vm2, %v1080_v22, %v1081_v62  ;;  %v408_v6 = vshrl.u32 %v2858_v63, 16  ;;  %v414_v14 = vshll.u32 %v2863_v52, 16 }
  0x6a   : > { %v2141_v18 = vcombine.low %v1079_v54, %v1082_v7  ;;  %v400_v17 = vrot.slane %v398_v37, 5  ;;  %v406_v20 = vrot.slane %v404_v10, 5  ;;  %v299_v40 = vshrl.u32 %v2871_v5, 16  ;;  %v2917_v54 = vld [vmem:[%s2477_s24 + $0x54] sm:$0xf] }
  0x6b   : > { %1185 = vrot.lane.b32.xlu0 %v2086_v35, %s2412_s27  ;;  %v410_v44 = vrot.slane %v408_v6, 4  ;;  %v416_v13 = vrot.slane %v414_v14, 5  ;;  %v302_v21 = vshll.u32 %v2871_v5, 16  ;;  %v308_v19 = vshll.u32 %v2879_v3, 16  ;;  %v2925_v37 = vld [vmem:[%s2477_s24 + $0x58] sm:$0xf] }
  0x6c   : > { %1487 = vrot.lane.b32.xlu1 %v2145_v49, %s2417_s9  ;;  %v401_v27 = vor.u32 %v400_v17, %v397_v45  ;;  %v301_v23 = vrot.slane %v299_v40, 4  ;;  %v312_v24 = vshrl.u32 %v2879_v3, 16  ;;  %v318_v26 = vshll.u32 %v2886_v16, 16  ;;  %v2932_v14 = vld [vmem:[%s2477_s24 + $0x24] sm:$0xf] }
  0x6d   : > { %v411_v31 = vor.u32 %v410_v44, %v406_v20  ;;  %v304_v30 = vrot.slane %v302_v21, 5  ;;  %v310_v59 = vrot.slane %v308_v19, 5  ;;  %v1990_v33 = vrot.slane %v424_v48, 9 }
  0x6e   : > { %v402_v25 = vrot.slane %v401_v27, 4  ;;  %v314_v34 = vrot.slane %v312_v24, 4  ;;  %v320_v36 = vrot.slane %v318_v26, 5  ;;  %v497_v38 = vrot.slane %v2808_v1, 5  ;;  %v2008_v24 = vld [vmem:[%s2477_s24 + $0x60] sm:$0xf] }
  0x6f   : > { %1479 = vrot.lane.b32.xlu0 %v2141_v18, %s2417_s9  ;;  %v412_v42 = vrot.slane %v411_v31, 4  ;;  %v305_v43 = vor.u32 %v304_v30, %v301_v23  ;;  %v500_v41 = vrot.slane %v2819_v32, 5  ;;  %v1986_v46 = vrot.slane %v420_v28, 9  ;;  %v421_v32 = vld [vmem:[%s2477_s24 + $0x24] sm:$0xe] }
  0x70   : > { %v407_v47 = vsel %vm2591_vm5, %v402_v25, %v406_v20  ;;  %v315_v51 = vor.u32 %v314_v34, %v310_v59  ;;  %v498_v57 = vsel %vm2525_vm2, %v1990_v33, %v497_v38  ;;  %v499_v53 = vrot.slane %v497_v38, 4  ;;  %v2953_v26 = vld [vmem:[%s2477_s24 + $0x64] sm:$0xf]  ;;  %v2959_v33 = vld [vmem:[%s2477_s24 + $0x30] sm:$0xf] }
  0x71   : > { %v417_v1 = vsel %vm2591_vm5, %v412_v42, %v416_v13  ;;  %v306_v55 = vrot.slane %v305_v43, 4  ;;  %v469_v29 = vrot.slane %v2827_v12, 5  ;;  %v472_v56 = vrot.slane %v2833_v9, 5  ;;  %v2943_v13 = vld [vmem:[%s2477_s24 + $0x28] sm:$0xf] }
  0x72   : > { %v2091_v61 = vcombine.low %v407_v47, %v417_v1  ;;  %v316_v62 = vrot.slane %v315_v51, 4  ;;  %v501_v11 = vsel %vm2525_vm2, %v499_v53, %v500_v41  ;;  %v1991_v0 = vrot.slane %v425_v60, 9  ;;  %v2962_v25 = vld [vmem:[%s2477_s24 + $0x34] sm:$0xf]  ;;  %v2975_v1 = vld [vmem:[%s2477_s24 + $0x5c] sm:$0x1] }
  0x73   : > { %v311_v2 = vsel %vm2591_vm5, %v306_v55, %v310_v59  ;;  %v2098_v4 = vcombine.low %v498_v57, %v501_v11  ;;  %v470_v15 = vsel %vm2525_vm2, %v1986_v46, %v469_v29  ;;  %v471_v49 = vrot.slane %v469_v29, 4 }
  0x74   : > { %1195 = vrot.lane.b32.xlu1 %v2091_v61, %s2412_s27  ;;  %v321_v9 = vsel %vm2591_vm5, %v316_v62, %v320_v36  ;;  %v504_v22 = vrot.slane %v2858_v63, 5  ;;  %v507_v8 = vrot.slane %v2863_v52, 5  ;;  %v1987_v45 = vrot.slane %v421_v32, 9  ;;  %v2980_v61 = vld [vmem:[%s2477_s24 + $0x2c] sm:$0x1] }
  0x75   : > { %v2087_v10 = vcombine.low %v311_v2, %v321_v9  ;;  %v473_v35 = vsel %vm2525_vm2, %v471_v49, %v472_v56  ;;  %v476_v7 = vrot.slane %v2879_v3, 5  ;;  %v479_v6 = vrot.slane %v2886_v16, 5 }
  0x76   : > { %v2094_v18 = vcombine.low %v470_v15, %v473_v35  ;;  %v505_v52 = vsel %vm2525_vm2, %v1991_v0, %v504_v22  ;;  %v506_v17 = vrot.slane %v504_v22, 4  ;;  %v682_v20 = vshrl.u32 %v2917_v54, 16 }
  0x77   : > { %1187 = vrot.lane.b32.xlu0 %v2087_v10, %s2412_s27  ;;  %v477_v40 = vsel %vm2525_vm2, %v1987_v45, %v476_v7  ;;  %v478_v48 = vrot.slane %v476_v7, 4  ;;  %v685_v16 = vshll.u32 %v2917_v54, 16  ;;  %v695_v44 = vshrl.u32 %v2925_v37, 16 }
  0x78   : > { %1233 = vrot.lane.b32.xlu1 %v2098_v4, %s2411_s26  ;;  %v508_v21 = vsel %vm2525_vm2, %v506_v17, %v507_v8  ;;  %v684_v19 = vrot.slane %v682_v20, 4  ;;  %v2106_v27 = vcombine.low %v2917_v54, %v2925_v37  ;;  %v586_v23 = vshrl.u32 %v2932_v14, 16 }
  0x79   : > { %v2099_v28 = vcombine.low %v505_v52, %v508_v21  ;;  %v480_v31 = vsel %vm2525_vm2, %v478_v48, %v479_v6  ;;  %v687_v30 = vrot.slane %v685_v16, 5  ;;  %v589_v59 = vshll.u32 %v2932_v14, 16  ;;  %v2989_v6 = vld [vmem:[%s2477_s24 + $0x68] sm:$0x1] }
  0x7a   : > { %v2095_v34 = vcombine.low %v477_v40, %v480_v31  ;;  %v588_v36 = vrot.slane %v586_v23, 4  ;;  %v599_v38 = vshrl.u32 %v2943_v13, 16  ;;  %v2102_v42 = vcombine.low %v2932_v14, %v2943_v13 }
  0x7b   : > { %1225 = vrot.lane.b32.xlu0 %v2094_v18, %s2411_s26  ;;  %v591_v43 = vrot.slane %v589_v59, 5  ;;  %v706_v41 = vshrl.u32 %v2008_v24, 16  ;;  %v709_v46 = vshll.u32 %v2008_v24, 16  ;;  %v719_v60 = vshrl.u32 %v2953_v26, 16 }
  0x7c   : > { %1235 = vrot.lane.b32.xlu1 %v2099_v28, %s2411_s26  ;;  %v2107_v47 = vcombine.low %v2008_v24, %v2953_v26  ;;  %v610_v51 = vshrl.u32 %v2959_v33, 16  ;;  %v613_v57 = vshll.u32 %v2959_v33, 16  ;;  %v623_v53 = vshrl.u32 %v2962_v25, 16 }
  0x7d   : > { %v708_v55 = vrot.slane %v706_v41, 4  ;;  %v711_v29 = vrot.slane %v709_v46, 5  ;;  %v2103_v56 = vcombine.low %v2959_v33, %v2962_v25  ;;  %v688_v32 = vor.u32 %v687_v30, %v684_v19  ;;  %v2024_v33 = vld [vmem:[%s2477_s24 + $0x54] sm:$0xe] }
  0x7e   : > { %v612_v62 = vrot.slane %v610_v51, 4  ;;  %v615_v11 = vrot.slane %v613_v57, 5  ;;  %v691_v0 = vshll.u32 %v2925_v37, 16  ;;  %v697_v2 = vrot.slane %v695_v44, 4 }
  0x7f   : > { %1227 = vrot.lane.b32.xlu0 %v2095_v34, %s2411_s26  ;;  %v689_v4 = vrot.slane %v688_v32, 4  ;;  %v701_v15 = vshll.u32 %v2975_v1, 16  ;;  %v592_v49 = vor.u32 %v591_v43, %v588_v36  ;;  %v595_v54 = vshll.u32 %v2943_v13, 16 }
  0x80   : > { %1281 = vrot.lane.b32.xlu1 %v2106_v27, %s2410_s25  ;;  %v693_v9 = vrot.slane %v691_v0, 5  ;;  %v601_v22 = vrot.slane %v599_v38, 4  ;;  %v605_v8 = vshll.u32 %v2980_v61, 16  ;;  %v712_v45 = vor.u32 %v711_v29, %v708_v55  ;;  %v3000_v27 = vld [vmem:[%s2477_s24 + $0x38] sm:$0x1] }
  0x81   : > { %v703_v10 = vrot.slane %v701_v15, 5  ;;  %v593_v35 = vrot.slane %v592_v49, 4  ;;  %v597_v7 = vrot.slane %v595_v54, 5  ;;  %v715_v14 = vshll.u32 %v2953_v26, 16  ;;  %v2025_v29 = vld [vmem:[%s2477_s24 + $0x60] sm:$0xe] }
  0x82   : > { %v694_v18 = vsel %vm2591_vm5, %v689_v4, %v693_v9  ;;  %v698_v52 = vor.u32 %v697_v2, %v693_v9  ;;  %v607_v17 = vrot.slane %v605_v8, 5  ;;  %v713_v20 = vrot.slane %v712_v45, 4  ;;  %v2021_v49 = vld [vmem:[%s2477_s24 + $0x30] sm:$0xe] }
  0x83   : > { %1273 = vrot.lane.b32.xlu0 %v2102_v42, %s2410_s25  ;;  %v598_v40 = vsel %vm2591_vm5, %v593_v35, %v597_v7  ;;  %v602_v48 = vor.u32 %v601_v22, %v597_v7  ;;  %v717_v16 = vrot.slane %v715_v14, 5  ;;  %v721_v44 = vrot.slane %v719_v60, 4 }
  0x84   : > { %1283 = vrot.lane.b32.xlu1 %v2107_v47, %s2410_s25  ;;  %v699_v21 = vrot.slane %v698_v52, 4  ;;  %v725_v19 = vshll.u32 %v2989_v6, 16  ;;  %v616_v23 = vor.u32 %v615_v11, %v612_v62  ;;  %v619_v24 = vshll.u32 %v2962_v25, 16  ;;  %v2020_v47 = vld [vmem:[%s2477_s24 + $0x24] sm:$0xe] }
  0x85   : > { %v603_v28 = vrot.slane %v602_v48, 4  ;;  %v718_v31 = vsel %vm2591_vm5, %v713_v20, %v717_v16  ;;  %v722_v30 = vor.u32 %v721_v44, %v717_v16  ;;  %v625_v59 = vrot.slane %v623_v53, 4  ;;  %v3042_v52 = vld [vmem:[%s2477_s24 + $0x64] sm:$0xf]  ;;  %v3049_v48 = vld [vmem:[%s2477_s24 + $0x30] sm:$0xf] }
  0x86   : > { %v704_v34 = vsel %vm2591_vm5, %v699_v21, %v703_v10  ;;  %v727_v36 = vrot.slane %v725_v19, 5  ;;  %v617_v38 = vrot.slane %v616_v23, 4  ;;  %v621_v42 = vrot.slane %v619_v24, 5  ;;  %v3033_v10 = vld [vmem:[%s2477_s24 + $0x60] sm:$0xf] }
  0x87   : > { %1275 = vrot.lane.b32.xlu0 %v2103_v56, %s2410_s25  ;;  %v2114_v43 = vcombine.low %v694_v18, %v704_v34  ;;  %v608_v41 = vsel %vm2591_vm5, %v603_v28, %v607_v17  ;;  %v723_v46 = vrot.slane %v722_v30, 4  ;;  %v629_v60 = vshll.u32 %v3000_v27, 16  ;;  %v3056_v19 = vld [vmem:[%s2477_s24 + $0x34] sm:$0xf]  ;;  %v3065_v30 = vld [vmem:[%s2477_s24 + $0x6c] sm:$0xf] }
  0x88   : > { %v2110_v51 = vcombine.low %v598_v40, %v608_v41  ;;  %v622_v57 = vsel %vm2591_vm5, %v617_v38, %v621_v42  ;;  %v626_v53 = vor.u32 %v625_v59, %v621_v42  ;;  %v2032_v55 = vrot.slane %v2024_v33, 9  ;;  %v3071_v34 = vld [vmem:[%s2477_s24 + $0x70] sm:$0xf]  ;;  %v3077_v41 = vld [vmem:[%s2477_s24 + $0x3c] sm:$0xf] }
  0x89   : > { %1321 = vrot.lane.b32.xlu1 %v2114_v43, %s2413_s28  ;;  %v728_v56 = vsel %vm2591_vm5, %v723_v46, %v727_v36  ;;  %v631_v32 = vrot.slane %v629_v60, 5  ;;  %v805_v62 = vrot.slane %v2925_v37, 5  ;;  %v808_v11 = vrot.slane %v2975_v1, 5 }
  0x8a   : > { %v2115_v0 = vcombine.low %v718_v31, %v728_v56  ;;  %v627_v2 = vrot.slane %v626_v53, 4  ;;  %v2028_v4 = vrot.slane %v2020_v47, 9  ;;  %v777_v15 = vrot.slane %v2943_v13, 5  ;;  %v3035_v35 = vpop.permute.xlu1 %1277 }
  0x8b   : > { %1313 = vrot.lane.b32.xlu0 %v2110_v51, %s2413_s28  ;;  %v806_v54 = vsel %vm2525_vm2, %v2032_v55, %v805_v62  ;;  %v807_v9 = vrot.slane %v805_v62, 4  ;;  %v780_v22 = vrot.slane %v2980_v61, 5  ;;  %v2033_v8 = vrot.slane %v2025_v29, 9  ;;  %v3079_v46 = vpop.permute.xlu0 %1269  ;;  %v3091_v55 = vld [vmem:[%s2477_s24 + $0x40] sm:$0xf] }
  0x8c   : > { %v632_v37 = vsel %vm2591_vm5, %v627_v2, %v631_v32  ;;  %v778_v1 = vsel %vm2525_vm2, %v2028_v4, %v777_v15  ;;  %v779_v45 = vrot.slane %v777_v15, 4  ;;  %v812_v13 = vrot.slane %v2953_v26, 5 }
  0x8d   : > { %1323 = vrot.lane.b32.xlu1 %v2115_v0, %s2413_s28  ;;  %v2111_v7 = vcombine.low %v622_v57, %v632_v37  ;;  %v809_v61 = vsel %vm2525_vm2, %v807_v9, %v808_v11  ;;  %v815_v14 = vrot.slane %v2989_v6, 5  ;;  %v2029_v18 = vrot.slane %v2021_v49, 9  ;;  %v3095_v11 = vld [vmem:[%s2477_s24 + $0x68] sm:$0x1] }
  0x8e   : > { %v2122_v17 = vcombine.low %v806_v54, %v809_v61  ;;  %v781_v26 = vsel %vm2525_vm2, %v779_v45, %v780_v22  ;;  %v813_v20 = vsel %vm2525_vm2, %v2033_v8, %v812_v13  ;;  %v814_v40 = vrot.slane %v812_v13, 4  ;;  %v3081_v60 = vpop.permute.xlu1 %1279  ;;  %v3106_v8 = vld [vmem:[%s2477_s24 + $0x38] sm:$0x1] }
  0x8f   : > { %1315 = vrot.lane.b32.xlu0 %v2111_v7, %s2413_s28  ;;  %v2118_v16 = vcombine.low %v778_v1, %v781_v26  ;;  %v784_v6 = vrot.slane %v2962_v25, 5  ;;  %v787_v44 = vrot.slane %v3000_v27, 5  ;;  %v990_v21 = vshrl.u32 %v3033_v10, 16 }
  0x90   : > { %v816_v23 = vsel %vm2525_vm2, %v814_v40, %v815_v14  ;;  %v993_v24 = vshll.u32 %v3033_v10, 16  ;;  %v1003_v28 = vshrl.u32 %v3042_v52, 16  ;;  %v2130_v31 = vcombine.low %v3033_v10, %v3042_v52 }
  0x91   : > { %1361 = vrot.lane.b32.xlu1 %v2122_v17, %s2414_s29  ;;  %v2123_v25 = vcombine.low %v813_v20, %v816_v23  ;;  %v785_v27 = vsel %vm2525_vm2, %v2029_v18, %v784_v6  ;;  %v786_v59 = vrot.slane %v784_v6, 4  ;;  %v992_v33 = vrot.slane %v990_v21, 4  ;;  %v3112_v18 = vpop.permute.xlu0 %1271 }
  0x92   : > { %v995_v36 = vrot.slane %v993_v24, 5  ;;  %v894_v38 = vshrl.u32 %v3049_v48, 16  ;;  %v897_v42 = vshll.u32 %v3049_v48, 16  ;;  %v907_v43 = vshrl.u32 %v3056_v19, 16 }
  0x93   : > { %1353 = vrot.lane.b32.xlu0 %v2118_v16, %s2414_s29  ;;  %v788_v47 = vsel %vm2525_vm2, %v786_v59, %v787_v44  ;;  %v2126_v51 = vcombine.low %v3049_v48, %v3056_v19  ;;  %v1014_v57 = vshrl.u32 %v3065_v30, 16  ;;  %v1017_v53 = vshll.u32 %v3065_v30, 16  ;;  %v3119_v44 = vld [vmem:[%s2477_s24 + $0x74] sm:$0x1] }
  0x94   : > { %v2119_v29 = vcombine.low %v785_v27, %v788_v47  ;;  %v896_v56 = vrot.slane %v894_v38, 4  ;;  %v899_v32 = vrot.slane %v897_v42, 5  ;;  %v1027_v62 = vshrl.u32 %v3071_v34, 16  ;;  %v3130_v42 = vld [vmem:[%s2477_s24 + $0x44] sm:$0x1] }
  0x95   : > { %1363 = vrot.lane.b32.xlu1 %v2123_v25, %s2414_s29  ;;  %v1016_v0 = vrot.slane %v1014_v57, 4  ;;  %v1019_v2 = vrot.slane %v1017_v53, 5  ;;  %v2131_v4 = vcombine.low %v3065_v30, %v3071_v34  ;;  %v918_v15 = vshrl.u32 %v3077_v41, 16 }
  0x96   : > { %v921_v49 = vshll.u32 %v3077_v41, 16  ;;  %v931_v54 = vshrl.u32 %v3091_v55, 16  ;;  %v2127_v9 = vcombine.low %v3077_v41, %v3091_v55  ;;  %v996_v22 = vor.u32 %v995_v36, %v992_v33  ;;  %v3114_v17 = vpop.permute.xlu1 %1229 }
  0x97   : > { %1355 = vrot.lane.b32.xlu0 %v2119_v29, %s2414_s29  ;;  %v920_v37 = vrot.slane %v918_v15, 4  ;;  %v999_v1 = vshll.u32 %v3042_v52, 16  ;;  %v1005_v45 = vrot.slane %v1003_v28, 4  ;;  %v1009_v13 = vshll.u32 %v3095_v11, 16  ;;  %v2066_v29 = vld [vmem:[%s2477_s24 + $0x60] sm:$0xe] }
  0x98   : > { %v923_v10 = vrot.slane %v921_v49, 5  ;;  %v997_v7 = vrot.slane %v996_v22, 4  ;;  %v900_v61 = vor.u32 %v899_v32, %v896_v56  ;;  %v903_v14 = vshll.u32 %v3056_v19, 16  ;;  %v3136_v56 = vpop.permute.xlu0 %1221 }
  0x99   : > { %1409 = vrot.lane.b32.xlu1 %v2130_v31, %s2415_s30  ;;  %v1001_v26 = vrot.slane %v999_v1, 5  ;;  %v1011_v20 = vrot.slane %v1009_v13, 5  ;;  %v909_v40 = vrot.slane %v907_v43, 4  ;;  %v913_v48 = vshll.u32 %v3106_v8, 16 }
  0x9a   : > { %v901_v16 = vrot.slane %v900_v61, 4  ;;  %v905_v6 = vrot.slane %v903_v14, 5  ;;  %v1020_v21 = vor.u32 %v1019_v2, %v1016_v0  ;;  %v1023_v23 = vshll.u32 %v3071_v34, 16  ;;  %v3138_v32 = vpop.permute.xlu1 %1231 }
  0x9b   : > { %1401 = vrot.lane.b32.xlu0 %v2126_v51, %s2415_s30  ;;  %v1002_v24 = vsel %vm2591_vm5, %v997_v7, %v1001_v26  ;;  %v1006_v28 = vor.u32 %v1005_v45, %v1001_v26  ;;  %v915_v31 = vrot.slane %v913_v48, 5  ;;  %v1029_v30 = vrot.slane %v1027_v62, 4 }
  0x9c   : > { %v906_v25 = vsel %vm2591_vm5, %v901_v16, %v905_v6  ;;  %v910_v27 = vor.u32 %v909_v40, %v905_v6  ;;  %v1021_v59 = vrot.slane %v1020_v21, 4  ;;  %v1025_v33 = vrot.slane %v1023_v23, 5  ;;  %v2063_v6 = vld [vmem:[%s2477_s24 + $0x3c] sm:$0xe] }
  0x9d   : > { %1411 = vrot.lane.b32.xlu1 %v2131_v4, %s2415_s30  ;;  %v1007_v36 = vrot.slane %v1006_v28, 4  ;;  %v1033_v38 = vshll.u32 %v3119_v44, 16  ;;  %v924_v43 = vor.u32 %v923_v10, %v920_v37  ;;  %v927_v41 = vshll.u32 %v3091_v55, 16  ;;  %v2062_v37 = vld [vmem:[%s2477_s24 + $0x30] sm:$0xe] }
  0x9e   : > { %v911_v47 = vrot.slane %v910_v27, 4  ;;  %v1026_v51 = vsel %vm2591_vm5, %v1021_v59, %v1025_v33  ;;  %v1030_v57 = vor.u32 %v1029_v30, %v1025_v33  ;;  %v933_v53 = vrot.slane %v931_v54, 4  ;;  %v2067_v10 = vld [vmem:[%s2477_s24 + $0x6c] sm:$0xe] }
  0x9f   : > { %1403 = vrot.lane.b32.xlu0 %v2127_v9, %s2415_s30  ;;  %v1012_v62 = vsel %vm2591_vm5, %v1007_v36, %v1011_v20  ;;  %v1035_v0 = vrot.slane %v1033_v38, 5  ;;  %v925_v2 = vrot.slane %v924_v43, 4  ;;  %v929_v4 = vrot.slane %v927_v41, 5 }
  0xa0   : > { %v2138_v15 = vcombine.low %v1002_v24, %v1012_v62  ;;  %v916_v49 = vsel %vm2591_vm5, %v911_v47, %v915_v31  ;;  %v1031_v22 = vrot.slane %v1030_v57, 4  ;;  %v937_v54 = vshll.u32 %v3130_v42, 16  ;;  %v3161_v31 = vpop.permute.xlu0 %1223 }
  0xa1   : > { %v2134_v1 = vcombine.low %v906_v25, %v916_v49  ;;  %v930_v45 = vsel %vm2591_vm5, %v925_v2, %v929_v4  ;;  %v934_v9 = vor.u32 %v933_v53, %v929_v4  ;;  %v2074_v13 = vrot.slane %v2066_v29, 9 }
  0xa2   : > { %1449 = vrot.lane.b32.xlu1 %v2138_v15, %s2416_s8  ;;  %v1036_v7 = vsel %vm2591_vm5, %v1031_v22, %v1035_v0  ;;  %v939_v61 = vrot.slane %v937_v54, 5  ;;  %v1113_v14 = vrot.slane %v3042_v52, 5  ;;  %v1116_v26 = vrot.slane %v3095_v11, 5  ;;  %v3163_v52 = vpop.permute.xlu1 %1183 }
  0xa3   : > { %1441 = vrot.lane.b32.xlu0 %v2134_v1, %s2416_s8  ;;  %v2139_v20 = vcombine.low %v1026_v51, %v1036_v7  ;;  %v935_v40 = vrot.slane %v934_v9, 4  ;;  %v2070_v48 = vrot.slane %v2062_v37, 9  ;;  %v1085_v16 = vrot.slane %v3056_v19, 5 }
  0xa4   : > { %v1114_v21 = vsel %vm2525_vm2, %v2074_v13, %v1113_v14  ;;  %v1115_v23 = vrot.slane %v1113_v14, 4  ;;  %v1088_v24 = vrot.slane %v3106_v8, 5  ;;  %v2075_v28 = vrot.slane %v2067_v10, 9  ;;  %v2359_v13 = vld [vmem:[%s2477_s24 + $0x34] sm:$0xf] }
  0xa5   : > { %v940_v11 = vsel %vm2591_vm5, %v935_v40, %v939_v61  ;;  %v1086_v30 = vsel %vm2525_vm2, %v2070_v48, %v1085_v16  ;;  %v1087_v25 = vrot.slane %v1085_v16, 4  ;;  %v1120_v19 = vrot.slane %v3071_v34, 5  ;;  %v2360_v10 = vld [vmem:[%s2477_s24 + $0x30] sm:$0xf] }
  0xa6   : > { %1451 = vrot.lane.b32.xlu1 %v2139_v20, %s2416_s8  ;;  %v2135_v27 = vcombine.low %v930_v45, %v940_v11  ;;  %v1117_v8 = vsel %vm2525_vm2, %v1115_v23, %v1116_v26  ;;  %v1123_v59 = vrot.slane %v3119_v44, 5  ;;  %v2071_v33 = vrot.slane %v2063_v6, 9  ;;  %v1182_v29 = vpop.permute.xlu0 %1181  ;;  %v2361_v26 = vld [vmem:[%s2477_s24 + $0x4] sm:$0xf]  ;;  %v2362_v20 = vld [vmem:[%s2477_s24] sm:$0xf] }
  0xa7   : > { %v2146_v36 = vcombine.low %v1114_v21, %v1117_v8  ;;  %v1089_v58 = vsel %vm2525_vm2, %v1087_v25, %v1088_v24  ;;  %v1121_v38 = vsel %vm2525_vm2, %v2075_v28, %v1120_v19  ;;  %v1122_v43 = vrot.slane %v1120_v19, 4  ;;  %v2364_v19 = vld [vmem:[%s2477_s24 + $0x3c] sm:$0xf] }
  0xa8   : > { %1443 = vrot.lane.b32.xlu0 %v2135_v27, %s2416_s8  ;;  %v2142_v34 = vcombine.low %v1086_v30, %v1089_v58  ;;  %v1092_v41 = vrot.slane %v3091_v55, 5  ;;  %v1095_v47 = vrot.slane %v3130_v42, 5  ;;  %v2356_v42 = vld [vmem:[%s3334_s1 + $0x10] ss:$0 sps:$4 sm:$0x33]   ;;  %v2080_v7 = vcombine.low %v2360_v10, %v2359_v13 }
  0xa9   : > { %v1124_v51 = vsel %vm2525_vm2, %v1122_v43, %v1123_v59  ;;  %2281 = vmatprep.subr.msk.bf16.mxu0 %vm1681_vm6, %v2356_v42  ;;  %2282 = vmatprep.subr.msk.bf16.mxu1 %vm1681_vm6, %v2356_v42  ;;  %v1683_v15 = vsel %vm1681_vm6, %v2356_v42, 0  ;;  %v2076_v40 = vcombine.low %v2362_v20, %v2361_v26  ;;  %v2365_v43 = vld [vmem:[%s2477_s24 + $0x10] sm:$0xf] }
  0xaa   : > { %1489 = vrot.lane.b32.xlu1 %v2146_v36, %s2417_s9  ;;  %v2147_v44 = vcombine.low %v1121_v38, %v1124_v51  ;;  %v1093_v57 = vsel %vm2525_vm2, %v2071_v33, %v1092_v41  ;;  %v1094_v53 = vrot.slane %v1092_v41, 4  ;;  %v3186_v62 = vpop.permute.xlu1 %1191  ;;  %2258 = vmatpush3.bf16.msra.mxu0 %v1683_v15 }
  0xab   : > { %2280 = vmatpush3.bf16.msra.mxu1 %v1683_v15  ;;  %v1496_v21 = vsel %vm1493_vm7, %v2076_v40, %v1182_v29 }
  0xac   : > { %1481 = vrot.lane.b32.xlu0 %v2142_v34, %s2417_s9  ;;  %v1096_v55 = vsel %vm2525_vm2, %v1094_v53, %v1095_v47  ;;  %v1520_v11 = vsel %vm1518_vm8, %v1496_v21, %v3136_v56  ;;  %v2366_v34 = vld [vmem:[%s2477_s24 + $0xc] sm:$0xf] }
  0xad   : > { %v2143_v0 = vcombine.low %v1093_v57, %v1096_v55  ;;  %v1537_v8 = vsel %vm1535_vm9, %v1520_v11, %v3079_v46  ;;  %v2077_v41 = vcombine.low %v2366_v34, %v2365_v43 }
  0xae   : > { %1491 = vrot.lane.b32.xlu1 %v2147_v44, %s2417_s9 }
  0xaf   : > { %v1318_v2 = vpop.permute.xlu1 %1317  ;;  %v1499_v29 = vsel %vm1493_vm7, %v2077_v41, %v3163_v52  ;;  %v2079_v41 = vcombine.low %v2871_v5, %v2879_v3 }
  0xb0   : > { %1483 = vrot.lane.b32.xlu0 %v2143_v0, %s2417_s9  ;;  %v1190_v4 = vpop.permute.xlu0 %1189  ;;  %v1522_v0 = vsel %vm1518_vm8, %v1499_v29, %v3161_v31 }
  0xb1   : > { %v1508_v48 = vsel %vm1493_vm7, %v2080_v7, %v1190_v4  ;;  %v1539_v15 = vsel %vm1535_vm9, %v1522_v0, %v3112_v18 }
  0xb2   : > { %v1528_v6 = vsel %vm1518_vm8, %v1508_v48, %v3114_v17  ;;  %v2363_v17 = vld [vmem:[%s2477_s24 + $0x40] sm:$0xf] }
  0xb3   : > { %v1545_v24 = vsel %vm1535_vm9, %v1528_v6, %v3035_v35  ;;  %v2081_v27 = vcombine.low %v2364_v19, %v2363_v17 }
  0xb4   : > { %v1310_v39 = vpop.permute.xlu0 %1309  ;;  %v1562_v25 = vsel %vm1552_vm10, %v1545_v24, %v1318_v2 }
  0xb5   : > { %v1320_v49 = vpop.permute.xlu1 %1319  ;;  %v1554_v56 = vsel %vm1552_vm10, %v1537_v8, %v1310_v39  ;;  %v1511_v51 = vsel %vm1493_vm7, %v2081_v27, %v3186_v62  ;;  %v2367_v27 = vld [vmem:[%s2477_s24 + $0x48] sm:$0xf]  ;;  %v2368_v8 = vld [vmem:[%s2477_s24 + $0x4c] sm:$0xf] }
  0xb6   : > { %v1530_v55 = vsel %vm1518_vm8, %v1511_v51, %v3138_v32 }
  0xb7   : > { %v1547_v62 = vsel %vm1535_vm9, %v1530_v55, %v3081_v60 }
  0xb8   : > { %v3196_v22 = vpop.permute.xlu0 %1311  ;;  %v1564_v2 = vsel %vm1552_vm10, %v1547_v62, %v1320_v49 }
  0xb9   : > { %v1358_v54 = vpop.permute.xlu1 %1357  ;;  %v1556_v32 = vsel %vm1552_vm10, %v1539_v15, %v3196_v22 }
  0xba   : > { %v1579_v35 = vsel %vm1569_vm11, %v1562_v25, %v1358_v54 }
  0xbc   : > { %v1350_v37 = vpop.permute.xlu0 %1349 }
  0xbd   : > { %v1360_v1 = vpop.permute.xlu1 %1359  ;;  %v1571_v36 = vsel %vm1569_vm11, %v1554_v56, %v1350_v37 }
  0xbe   : > { %v1581_v4 = vsel %vm1569_vm11, %v1564_v2, %v1360_v1 }
  0xc0   : > { %v3198_v45 = vpop.permute.xlu0 %1351 }
  0xc1   : > { %v1406_v9 = vpop.permute.xlu1 %1405  ;;  %v1573_v60 = vsel %vm1569_vm11, %v1556_v32, %v3198_v45 }
  0xc2   : > { %v1596_v33 = vsel %vm1586_vm12, %v1579_v35, %v1406_v9  ;;  %v2082_v35 = vcombine.low %v2367_v27, %v2368_v8 }
  0xc4   : > { %v1398_v61 = vpop.permute.xlu0 %1397 }
  0xc5   : > { %v1408_v14 = vpop.permute.xlu1 %1407  ;;  %v1588_v47 = vsel %vm1586_vm12, %v1571_v36, %v1398_v61 }
  0xc6   : > { %v1598_v39 = vsel %vm1586_vm12, %v1581_v4, %v1408_v14 }
  0xc8   : > { %v1400_v16 = vpop.permute.xlu0 %1399 }
  0xc9   : > { %v1590_v49 = vsel %vm1586_vm12, %v1573_v60, %v1400_v16 }
  0xca   : > { %v1446_v23 = vpop.permute.xlu1 %1445 }
  0xcb   : > { %v1613_v58 = vsel %vm1603_vm13, %v1596_v33, %v1446_v23 }
  0xcc   : > { %v1438_v28 = vpop.permute.xlu0 %1437 }
  0xcd   : > { %v1605_v44 = vsel %vm1603_vm13, %v1588_v47, %v1438_v28 }
  0xce   : > { %v1448_v30 = vpop.permute.xlu1 %1447 }
  0xcf   : > { %v1615_v54 = vsel %vm1603_vm13, %v1598_v39, %v1448_v30 }
  0xd0   : > { %v1440_v59 = vpop.permute.xlu0 %1439 }
  0xd1   : > { %v1607_v18 = vsel %vm1603_vm13, %v1590_v49, %v1440_v59  ;;  %v2369_v59 = vld [vmem:[%s2477_s24 + $0x18] sm:$0xf]  ;;  %s1980_s24 = sshll.u32 %s190_s23, 2 }
  0xd2   : > { %v1486_v38 = vpop.permute.xlu1 %1485  ;;  %v2078_v56 = vcombine.low %v2369_v59, %v2827_v12  ;;  %s3308_s25 = scalar_lea.vmem %s3336_s3, %s1980_s24 }
  0xd3   : > { %v1630_v46 = vsel %vm1620_vm14, %v1613_v58, %v1486_v38  ;;  %v2083_v38 = vcombine.low %v2849_v50, %v2858_v63 }
  0xd4   : > { %v1478_v57 = vpop.permute.xlu0 %1477  ;;  %2267 = vmatprep.mubr.msk.bf16.mxu1 %vm1664_vm15, %v1630_v46 }
  0xd5   : > { %v1622_v53 = vsel %vm1620_vm14, %v1605_v44, %v1478_v57 }
  0xd6   : > { %2259 = vmatprep.mubr.msk.bf16.mxu0 %vm1664_vm15, %v1622_v53 }
  0xda   : > { %v1194_v42 = vpop.permute.xlu1 %1193 }
  0xdb   : > { %v1514_v58 = vsel %vm1493_vm7, %v2082_v35, %v1194_v42 }
  0xdd   : > { %v1186_v52 = vpop.permute.xlu0 %1185 }
  0xde   : > { %v1488_v31 = vpop.permute.xlu1 %1487  ;;  %v1502_v34 = vsel %vm1493_vm7, %v2078_v56, %v1186_v52 }
  0xdf   : > { %v1632_v37 = vsel %vm1620_vm14, %v1615_v54, %v1488_v31 }
  0xe0   : > { %2268 = vmatmul.mubr.msk.bf16.vlgmr.msra.gmra.mrb[0].mxu1 %vm1664_vm15, %v1632_v37 }
  0xe1   : > { %v1480_v1 = vpop.permute.xlu0 %1479 }
  0xe2   : > { %v1624_v9 = vsel %vm1620_vm14, %v1607_v18, %v1480_v1 }
  0xe3   : > { %2260 = vmatmul.mubr.msk.bf16.vlgmr.msra.gmra.mrb[0].mxu0 %vm1664_vm15, %v1624_v9 }
  0xe6   : > { %v1196_v22 = vpop.permute.xlu1 %1195 }
  0xe7   : > { %v1517_v44 = vsel %vm1493_vm7, %v2083_v38, %v1196_v22 }
  0xe9   : > { %v1188_v13 = vpop.permute.xlu0 %1187 }
  0xea   : > { %v1234_v10 = vpop.permute.xlu1 %1233  ;;  %v1505_v3 = vsel %vm1493_vm7, %v2079_v41, %v1188_v13 }
  0xeb   : > { %v1532_v43 = vsel %vm1518_vm8, %v1514_v58, %v1234_v10 }
  0xed   : > { %v1226_v7 = vpop.permute.xlu0 %1225 }
  0xee   : > { %v1236_v61 = vpop.permute.xlu1 %1235  ;;  %v1524_v51 = vsel %vm1518_vm8, %v1502_v34, %v1226_v7 }
  0xef   : > { %v1534_v53 = vsel %vm1518_vm8, %v1517_v44, %v1236_v61 }
  0xf1   : > { %v1228_v14 = vpop.permute.xlu0 %1227 }
  0xf2   : > { %v1282_v45 = vpop.permute.xlu1 %1281  ;;  %v1526_v2 = vsel %vm1518_vm8, %v1505_v3, %v1228_v14  ;;  %v2148_v14 = vld [vmem:[%s3335_s2] ss:$0 sm:$0xff] }
  0xf3   : > { %v1549_v47 = vsel %vm1535_vm9, %v1532_v43, %v1282_v45 }
  0xf5   : > { %v1274_v26 = vpop.permute.xlu0 %1273 }
  0xf6   : > { %v1284_v20 = vpop.permute.xlu1 %1283  ;;  %v1541_v57 = vsel %vm1535_vm9, %v1524_v51, %v1274_v26 }
  0xf7   : > { %v1551_v55 = vsel %vm1535_vm9, %v1534_v53, %v1284_v20 }
  0xf9   : > { %v1276_v40 = vpop.permute.xlu0 %1275 }
  0xfa   : > { %v1543_v52 = vsel %vm1535_vm9, %v1526_v2, %v1276_v40 }
  0xfb   : > { %v1322_v48 = vpop.permute.xlu1 %1321 }
  0xfc   : > { %v1566_v12 = vsel %vm1552_vm10, %v1549_v47, %v1322_v48 }
  0xfd   : > { %v1314_v16 = vpop.permute.xlu0 %1313 }
  0xfe   : > { %v1558_v29 = vsel %vm1552_vm10, %v1541_v57, %v1314_v16 }
  0xff   : > { %v1324_v6 = vpop.permute.xlu1 %1323 }
 0x100   : > { %v1568_v4 = vsel %vm1552_vm10, %v1551_v55, %v1324_v6 }
 0x101   : > { %v1316_v21 = vpop.permute.xlu0 %1315 }
 0x102   : > { %v1560_v60 = vsel %vm1552_vm10, %v1543_v52, %v1316_v21 }
 0x103   : > { %v1362_v23 = vpop.permute.xlu1 %1361 }
 0x104   : > { %v1583_v50 = vsel %vm1569_vm11, %v1566_v12, %v1362_v23 }
 0x105   : > { %v1354_v24 = vpop.permute.xlu0 %1353 }
 0x106   : > { %v1575_v0 = vsel %vm1569_vm11, %v1558_v29, %v1354_v24 }
 0x107   : > { %v1364_v28 = vpop.permute.xlu1 %1363 }
 0x108   : > { %v1585_v32 = vsel %vm1569_vm11, %v1568_v4, %v1364_v28 }
 0x109   : > { %v1356_v11 = vpop.permute.xlu0 %1355 }
 0x10a   : > { %v1577_v18 = vsel %vm1569_vm11, %v1560_v60, %v1356_v11 }
 0x10b   : > { %v1410_v30 = vpop.permute.xlu1 %1409 }
 0x10c   : > { %v1600_v5 = vsel %vm1586_vm12, %v1583_v50, %v1410_v30 }
 0x10d   : > { %v1402_v25 = vpop.permute.xlu0 %1401 }
 0x10e   : > { %v1592_v15 = vsel %vm1586_vm12, %v1575_v0, %v1402_v25 }
 0x10f   : > { %v1412_v17 = vpop.permute.xlu1 %1411 }
 0x110   : > { %v1602_v37 = vsel %vm1586_vm12, %v1585_v32, %v1412_v17 }
 0x111   : > { %v1404_v19 = vpop.permute.xlu0 %1403 }
 0x112   : > { %v1594_v22 = vsel %vm1586_vm12, %v1577_v18, %v1404_v19 }
 0x114   : > { %v1450_v33 = vpop.permute.xlu1 %1449 }
 0x115   : > { %v1442_v36 = vpop.permute.xlu0 %1441  ;;  %v1617_v62 = vsel %vm1603_vm13, %v1600_v5, %v1450_v33 }
 0x116   : > { %v1609_v54 = vsel %vm1603_vm13, %v1592_v15, %v1442_v36 }
 0x118   : > { %v1452_v46 = vpop.permute.xlu1 %1451 }
 0x119   : > { %v1619_v1 = vsel %vm1603_vm13, %v1602_v37, %v1452_v46 }
 0x11a   : > { %v1444_v63 = vpop.permute.xlu0 %1443 }
 0x11b   : > { %v1611_v10 = vsel %vm1603_vm13, %v1594_v22, %v1444_v63 }
 0x11c   : > { %v1490_v42 = vpop.permute.xlu1 %1489 }
 0x11d   : > { %v1634_v39 = vsel %vm1620_vm14, %v1617_v62, %v1490_v42 }
 0x11e   : > { %v1482_v31 = vpop.permute.xlu0 %1481  ;;  %2271 = vmatprep.mubr.msk.bf16.mxu1 %vm1664_vm15, %v1634_v39 }
 0x11f   : > { %v1626_v49 = vsel %vm1620_vm14, %v1609_v54, %v1482_v31 }
 0x120   : > { %2263 = vmatprep.mubr.msk.bf16.mxu0 %vm1664_vm15, %v1626_v49  ;;  %v1492_v9 = vpop.permute.xlu1 %1491 }
 0x121   : > { %v1636_v13 = vsel %vm1620_vm14, %v1619_v1, %v1492_v9 }
 0x122   : > { %v1484_v7 = vpop.permute.xlu0 %1483  ;;  %2272 = vmatmul.mubr.msk.bf16.gmra.mrb[4].mxu1 %vm1664_vm15, %v1636_v13 }
 0x123   : > { %v1628_v61 = vsel %vm1620_vm14, %v1611_v10, %v1484_v7 }
 0x124   : > { %2264 = vmatmul.mubr.msk.bf16.gmra.mrb[4].mxu0 %vm1664_vm15, %v1628_v61 }
 0x1b3   : > { %v2269_v45 = vpop.f32.mrb[0].mxu1 }
 0x1b4   : > { %v1760_v26 = vadd.f32 %v2269_v45, %v2148_v14  ;;  %v1751_v20 = vpop.f32.mrb[1].mxu1 }
 0x1b5   : > { %v1752_v40 = vadd.f32 %v2148_v14, %v1751_v20  ;;  %v2270_v48 = vpop.f32.mrb[2].mxu1 }
 0x1b6   : > { %v2261_v16 = vpop.f32.mrb[0].mxu0  ;;  %v1763_v6 = vadd.f32 %v2270_v48, %v2148_v14  ;;  %v1754_v21 = vpop.f32.mrb[3].mxu1  ;;  %v1792_v11 = vmax.f32 %v1760_v26, 0.0 }
 0x1b7   : > { %v1728_v23 = vadd.f32 %v2261_v16, %v2148_v14  ;;  %v1719_v24 = vpop.f32.mrb[1].mxu0  ;;  %v1755_v28 = vadd.f32 %v2148_v14, %v1754_v21  ;;  %v1790_v19 = vmax.f32 %v1752_v40, 0.0 }
 0x1b8   : > { %v1720_v30 = vadd.f32 %v2148_v14, %v1719_v24  ;;  %v2262_v25 = vpop.f32.mrb[2].mxu0  ;;  %v1793_v17 = vmax.f32 %v1763_v6, 0.0 }
 0x1b9   : > { %v1731_v27 = vadd.f32 %v2262_v25, %v2148_v14  ;;  %v1722_v8 = vpop.f32.mrb[3].mxu0  ;;  %v1791_v35 = vmax.f32 %v1755_v28, 0.0  ;;  %v1784_v33 = vmax.f32 %v1728_v23, 0.0 }
 0x1ba   : > { %v2223_v59 = vpack.c.bf16 %v1793_v17, %v1792_v11  ;;  %v1723_v56 = vadd.f32 %v2148_v14, %v1722_v8  ;;  %v1782_v38 = vmax.f32 %v1720_v30, 0.0 }
 0x1bb   : > { %v1785_v36 = vmax.f32 %v1731_v27, 0.0  ;;  %v2218_v58 = vpack.c.bf16 %v1791_v35, %v1790_v19 }
 0x1bc   : > { %2239 = vst [vmem:[%s3308_s25 + $0x28] sm:$0xff] %v2223_v59   ;;  %v1783_v43 = vmax.f32 %v1723_v56, 0.0 }
 0x1bd   : > { %v2203_v34 = vpack.c.bf16 %v1785_v36, %v1784_v33  ;;  %2238 = vst [vmem:[%s3308_s25 + $0x20] sm:$0xff] %v2218_v58  }
 0x1be   : > { %v2198_v41 = vpack.c.bf16 %v1783_v43, %v1782_v38 }
 0x1bf   : > { %2235 = vst [vmem:[%s3308_s25 + $0x8] sm:$0xff] %v2203_v34  }
 0x1c0   : > { %2199 = vst [vmem:[%s3308_s25] sm:$0xff] %v2198_v41  }
 0x1f5   : > { %v2273_v47 = vpop.f32.mrb[4].mxu1 }
 0x1f6   : > { %v1776_v46 = vadd.f32 %v2273_v47, %v2148_v14  ;;  %v1767_v51 = vpop.f32.mrb[5].mxu1 }
 0x1f7   : > { %v2265_v12 = vpop.f32.mrb[4].mxu0  ;;  %v1768_v44 = vadd.f32 %v2148_v14, %v1767_v51  ;;  %v2274_v57 = vpop.f32.mrb[6].mxu1 }
 0x1f8   : > { %v1744_v50 = vadd.f32 %v2265_v12, %v2148_v14  ;;  %v1735_v63 = vpop.f32.mrb[5].mxu0  ;;  %v1779_v53 = vadd.f32 %v2274_v57, %v2148_v14  ;;  %v1770_v29 = vpop.f32.mrb[7].mxu1  ;;  %v1796_v0 = vmax.f32 %v1776_v46, 0.0 }
 0x1f9   : > { %v1736_v5 = vadd.f32 %v2148_v14, %v1735_v63  ;;  %v2266_v3 = vpop.f32.mrb[6].mxu0  ;;  %v1771_v55 = vadd.f32 %v2148_v14, %v1770_v29  ;;  %v1794_v4 = vmax.f32 %v1768_v44, 0.0 }
 0x1fa   : > { %v1747_v62 = vadd.f32 %v2266_v3, %v2148_v14  ;;  %v1797_v42 = vmax.f32 %v1779_v53, 0.0  ;;  %v1738_v2 = vpop.f32.mrb[7].mxu0  ;;  %v1788_v52 = vmax.f32 %v1744_v50, 0.0 }
 0x1fb   : > { %v1739_v15 = vadd.f32 %v2148_v14, %v1738_v2  ;;  %v1795_v39 = vmax.f32 %v1771_v55, 0.0  ;;  %v1786_v31 = vmax.f32 %v1736_v5, 0.0 }
 0x1fc   : > { %v1789_v32 = vmax.f32 %v1747_v62, 0.0  ;;  %v2233_v54 = vpack.c.bf16 %v1797_v42, %v1796_v0 }
 0x1fd   : > { %v1787_v60 = vmax.f32 %v1739_v15, 0.0  ;;  %v2228_v37 = vpack.c.bf16 %v1795_v39, %v1794_v4 }
 0x1fe   : > { %v2213_v49 = vpack.c.bf16 %v1789_v32, %v1788_v52  ;;  %2241 = vst [vmem:[%s3308_s25 + $0x38] sm:$0xff] %v2233_v54  }
 0x1ff   : > { %v2208_v18 = vpack.c.bf16 %v1787_v60, %v1786_v31  ;;  %2240 = vst [vmem:[%s3308_s25 + $0x30] sm:$0xff] %v2228_v37  }
 0x200   : > { %2237 = vst [vmem:[%s3308_s25 + $0x18] sm:$0xff] %v2213_v49  }
 0x201   : > { %2236 = vst [vmem:[%s3308_s25 + $0x10] sm:$0xff] %v2208_v18  }
 0x202 PF: > { %s13_s16 = sadd.s32 1, %s2408_s16   ;;  %s3341_s12 = smov %s2400_s14 }
 0x203   : > { %p10_p7 = scmp.ge.s32.totalorder %s13_s16, 6   ;;  %s3342_s13 = smov %s2404_s15 }
 0x204   : > { %s3343_s14 = smov %s3346_s17  ;;  %s3344_s15 = smov %s3350_s18 }
 0x205   :  { %12 = sbr.rel (!%p10_p7) target bundleno = 3 (0x3), region = 65 }

</bundles_post_ra>
